<compile_context>
chip_gen: v7x
topology: tpu7x:2x2x1
jax: 0.10.0
libtpu: 0.0.40
codegen_flags: <defaults>
</compile_context>

<pallas_src>
import math

import jax
import jax.numpy as jnp
from jax.experimental import pallas as pl
from jax.experimental.pallas import tpu as pltpu

# ----- model config (small, consistent with the module's forward) -----
N_EMBD = 32
N_HEAD = 4
HEAD_DIM = N_EMBD // N_HEAD
EPS = 1e-5           # torch.nn.LayerNorm default
NEG_MASK = -1e30     # finite causal-mask bias


def _layernorm(x, w, b):
    mu = jnp.mean(x, axis=-1, keepdims=True)
    xc = x - mu
    var = jnp.mean(xc * xc, axis=-1, keepdims=True)
    return xc * jax.lax.rsqrt(var + EPS) * w + b


def _gelu_tanh(x):
    # GELU(approximate='tanh'): 0.5*x*(1 + tanh(sqrt(2/pi)*(x + 0.044715*x^3)))
    c = jnp.float32(0.7978845608028654)  # sqrt(2/pi)
    return 0.5 * x * (1.0 + jnp.tanh(c * (x + 0.044715 * x * x * x)))


def block_kernel(x_ref,
                 ln1w_ref, ln1b_ref,
                 wqkv_ref, bqkv_ref,
                 wpr_ref, bpr_ref,
                 ln2w_ref, ln2b_ref,
                 wfc_ref, bfc_ref,
                 wp2_ref, bp2_ref,
                 out_ref):
    f32, bf16 = jnp.float32, jnp.bfloat16
    H, D = N_HEAD, HEAD_DIM

    x = x_ref[...]                         # (bt, T, C) f32
    bt, T, C = x.shape
    x2d = x.reshape(bt * T, C)             # flatten rows for all row-wise ops

    # ---------------- ln_1 (f32) ----------------
    h = _layernorm(x2d, ln1w_ref[0], ln1b_ref[0])

    # ---------------- causal self-attention ----------------
    # qkv = h @ Wqkv + b   (1/sqrt(head_dim) already folded into the Q columns)
    qkv = jnp.dot(h.astype(bf16), wqkv_ref[...],
                  preferred_element_type=f32) + bqkv_ref[0]        # (bt*T, 3C) f32
    q = qkv[:, 0 * C:1 * C].reshape(bt, T, C)
    k = qkv[:, 1 * C:2 * C].reshape(bt, T, C)
    v = qkv[:, 2 * C:3 * C].reshape(bt, T, C)

    row = jax.lax.broadcasted_iota(jnp.int32, (T, T), 0)
    col = jax.lax.broadcasted_iota(jnp.int32, (T, T), 1)
    causal_bias = jnp.where(row >= col, 0.0, NEG_MASK).astype(f32)  # (T, T)

    # Per-head loop is static (H=4); every matmul inside is batched over the whole
    # block_b chunk, and each head's projection contribution is accumulated directly
    # (no lane-axis concatenates).
    y = jnp.zeros((bt * T, C), f32)
    for hh in range(H):
        qh = q[:, :, hh * D:(hh + 1) * D].astype(bf16)              # (bt, T, D)
        kh = k[:, :, hh * D:(hh + 1) * D].astype(bf16)
        vh = v[:, :, hh * D:(hh + 1) * D].astype(bf16)
        s = jnp.einsum('bqd,bkd->bqk', qh, kh,
                       preferred_element_type=f32)                  # (bt, T, T) f32
        s = s + causal_bias[None, :, :]
        s = s - jnp.max(s, axis=-1, keepdims=True)
        p = jnp.exp(s)
        p = p * pl.reciprocal(jnp.sum(p, axis=-1, keepdims=True), approx=True)
        o = jnp.einsum('bqk,bkd->bqd', p.astype(bf16), vh,
                       preferred_element_type=f32)                  # (bt, T, D) f32
        y = y + jnp.dot(o.reshape(bt * T, D).astype(bf16), wpr_ref[hh],
                        preferred_element_type=f32)                 # (bt*T, C)
    y = y + bpr_ref[0]

    # residual 1
    x1 = x2d + y

    # ---------------- ln_2 + MLP ----------------
    h2 = _layernorm(x1, ln2w_ref[0], ln2b_ref[0])
    ff = jnp.dot(h2.astype(bf16), wfc_ref[...],
                 preferred_element_type=f32) + bfc_ref[0]
    ff = _gelu_tanh(ff)
    ff = jnp.dot(ff.astype(bf16), wp2_ref[...],
                 preferred_element_type=f32) + bp2_ref[0]

    # residual 2
    out_ref[...] = (x1 + ff).reshape(bt, T, C).astype(out_ref.dtype)


def prepare_params(params):
    """One-time weight preprocessing (hoisted out of the forward call):
    pre-transpose Linear weights (out,in)->(in,out), cast matmul weights to bf16,
    lift 1-D params to (1, dim) for VMEM, fold 1/sqrt(head_dim) into the Q projection,
    and pre-split the attention output projection into per-head (D, C) slabs."""
    C = N_EMBD
    f32, bf16 = jnp.float32, jnp.bfloat16

    w_attn_t = params["w_attn"].astype(f32).T                        # (C, 3C)
    b_attn = params["b_attn"].astype(f32)
    qscale = jnp.concatenate([jnp.full((C,), 1.0 / math.sqrt(HEAD_DIM), f32),
                              jnp.ones((2 * C,), f32)])
    w_attn_t = w_attn_t * qscale[None, :]
    b_attn = b_attn * qscale

    w_proj_heads = params["w_proj"].astype(f32).T.reshape(N_HEAD, HEAD_DIM, C)

    return [
        params["ln1_w"].astype(f32).reshape(1, C), params["ln1_b"].astype(f32).reshape(1, C),
        w_attn_t.astype(bf16), b_attn.reshape(1, 3 * C),
        w_proj_heads.astype(bf16), params["b_proj"].astype(f32).reshape(1, C),
        params["ln2_w"].astype(f32).reshape(1, C), params["ln2_b"].astype(f32).reshape(1, C),
        params["w_fc"].astype(f32).T.astype(bf16), params["b_fc"].astype(f32).reshape(1, 4 * C),
        params["w_proj2"].astype(f32).T.astype(bf16), params["b_proj2"].astype(f32).reshape(1, C),
    ]


def _choose_block_b(B):
    """Batch elements per grid step: as many as possible to amortize per-step overhead,
    but keep >=2 grid steps once the batch is big enough (v7x has 2 TensorCores) and
    cap rows per step so activations stay comfortably inside VMEM."""
    if B < 16:
        return B
    target = min(B // 2, 256)
    for bt in range(target, 0, -1):
        if B % bt == 0:
            return bt
    return B


def gpt2_block(x, prepared, *, block_b=None):
    """x: (B, T, C) float32. prepared: output of prepare_params (call once per model)."""
    B, T, C = x.shape
    assert C == N_EMBD
    if block_b is None:
        block_b = _choose_block_b(B)
    assert B % block_b == 0
    grid_b = B // block_b

    def full_spec(a):
        nd = a.ndim
        return pl.BlockSpec(a.shape, lambda b, _nd=nd: (0,) * _nd)

    in_specs = ([pl.BlockSpec((block_b, T, C), lambda b: (b, 0, 0))]
                + [full_spec(a) for a in prepared])

    # NOTE: at real GPT-2 dims (C=768, T=1024) this full-resident-weight / whole-sequence
    # layout must be re-tiled (MLP over the 4C axis and/or T) and vmem_limit_bytes set
    # explicitly — especially for v7x's 64 MiB physical VMEM.
    return pl.pallas_call(
        block_kernel,
        out_shape=jax.ShapeDtypeStruct((B, T, C), x.dtype),
        grid_spec=pltpu.PrefetchScalarGridSpec(
            num_scalar_prefetch=0,
            grid=(grid_b,),
            in_specs=in_specs,
            out_specs=pl.BlockSpec((block_b, T, C), lambda b: (b, 0, 0)),
        ),
        compiler_params=pltpu.CompilerParams(dimension_semantics=("parallel",)),
    )(x, *prepared)


# ----------------- pure-JAX reference (for correctness check) -----------------
def reference_block(x, p):
    def ln(x, w, b):
        mu = x.mean(-1, keepdims=True)
        var = ((x - mu) ** 2).mean(-1, keepdims=True)
        return (x - mu) / jnp.sqrt(var + EPS) * w + b

    B, T, C = x.shape
    h = ln(x, p["ln1_w"], p["ln1_b"])
    qkv = h @ p["w_attn"].T + p["b_attn"]
    q, k, v = jnp.split(qkv, 3, axis=-1)
    q = q.reshape(B, T, N_HEAD, HEAD_DIM).transpose(0, 2, 1, 3)
    k = k.reshape(B, T, N_HEAD, HEAD_DIM).transpose(0, 2, 1, 3)
    v = v.reshape(B, T, N_HEAD, HEAD_DIM).transpose(0, 2, 1, 3)
    s = jnp.einsum("bhqd,bhkd->bhqk", q, k) / jnp.sqrt(jnp.float32(HEAD_DIM))
    mask = jnp.tril(jnp.ones((T, T), dtype=bool))
    s = jnp.where(mask, s, -jnp.inf)
    patt = jax.nn.softmax(s, axis=-1)
    y = jnp.einsum("bhqk,bhkd->bhqd", patt, v).transpose(0, 2, 1, 3).reshape(B, T, C)
    y = y @ p["w_proj"].T + p["b_proj"]
    x1 = x + y
    h2 = ln(x1, p["ln2_w"], p["ln2_b"])
    ff = h2 @ p["w_fc"].T + p["b_fc"]
    ff = jax.nn.gelu(ff, approximate=True)
    ff = ff @ p["w_proj2"].T + p["b_proj2"]
    return x1 + ff


def init_params(key):
    C = N_EMBD
    ks = jax.random.split(key, 4)
    std = 0.02
    return {
        "ln1_w": jnp.ones((C,), jnp.float32),
        "ln1_b": jnp.zeros((C,), jnp.float32),
        "w_attn": std * jax.random.normal(ks[0], (3 * C, C), jnp.float32),
        "b_attn": jnp.zeros((3 * C,), jnp.float32),
        "w_proj": std * jax.random.normal(ks[1], (C, C), jnp.float32),
        "b_proj": jnp.zeros((C,), jnp.float32),
        "ln2_w": jnp.ones((C,), jnp.float32),
        "ln2_b": jnp.zeros((C,), jnp.float32),
        "w_fc": std * jax.random.normal(ks[2], (4 * C, C), jnp.float32),
        "b_fc": jnp.zeros((4 * C,), jnp.float32),
        "w_proj2": std * jax.random.normal(ks[3], (C, 4 * C), jnp.float32),
        "b_proj2": jnp.zeros((C,), jnp.float32),
    }


if __name__ == "__main__":
    key = jax.random.PRNGKey(0)
    k_x, k_p = jax.random.split(key)

    B, T = 2, 8
    x = jax.random.normal(k_x, (B, T, N_EMBD), jnp.float32)
    params = init_params(k_p)

    prepared = prepare_params(params)        # hoisted: once per model, not per forward
    out = gpt2_block(x, prepared)
    out = jax.block_until_ready(out)

    ref = reference_block(x, params)
    assert out.shape == (B, T, N_EMBD)
    # bf16 MXU operands + approx reciprocal => slightly looser tolerance than pure f32
    assert jnp.allclose(out, ref, atol=2e-2, rtol=2e-2), (
        f"max abs err = {jnp.max(jnp.abs(out - ref))}")

    print("KERNEL_OK")
</pallas_src>

<mosaic_0001>
module attributes {stable_mosaic.version = 11 : i64} {
  func.func @block_kernel(%arg0: i32, %arg1: memref<2x8x32xf32, #tpu.memory_space<vmem>>, %arg2: memref<1x32xf32, #tpu.memory_space<vmem>>, %arg3: memref<1x32xf32, #tpu.memory_space<vmem>>, %arg4: memref<32x96xbf16, #tpu.memory_space<vmem>>, %arg5: memref<1x96xf32, #tpu.memory_space<vmem>>, %arg6: memref<4x8x32xbf16, #tpu.memory_space<vmem>>, %arg7: memref<1x32xf32, #tpu.memory_space<vmem>>, %arg8: memref<1x32xf32, #tpu.memory_space<vmem>>, %arg9: memref<1x32xf32, #tpu.memory_space<vmem>>, %arg10: memref<32x128xbf16, #tpu.memory_space<vmem>>, %arg11: memref<1x128xf32, #tpu.memory_space<vmem>>, %arg12: memref<128x32xbf16, #tpu.memory_space<vmem>>, %arg13: memref<1x32xf32, #tpu.memory_space<vmem>>, %arg14: memref<2x8x32xf32, #tpu.memory_space<vmem>>) attributes {dimension_semantics = [#tpu.dimension_semantics<parallel>], iteration_bounds = array<i64: 1>, scalar_prefetch = 0 : i64, scratch_operands = 0 : i64, tpu.core_type = #tpu.core_type<tc>, window_params = [{transform_indices = @transform_0, window_bounds = array<i64: 2, 8, 32>}, {pipeline_mode = #tpu.pipeline_mode<synchronous>, transform_indices = @transform_1, window_bounds = array<i64: 1, 32>}, {pipeline_mode = #tpu.pipeline_mode<synchronous>, transform_indices = @transform_2, window_bounds = array<i64: 1, 32>}, {pipeline_mode = #tpu.pipeline_mode<synchronous>, transform_indices = @transform_3, window_bounds = array<i64: 32, 96>}, {pipeline_mode = #tpu.pipeline_mode<synchronous>, transform_indices = @transform_4, window_bounds = array<i64: 1, 96>}, {pipeline_mode = #tpu.pipeline_mode<synchronous>, transform_indices = @transform_5, window_bounds = array<i64: 4, 8, 32>}, {pipeline_mode = #tpu.pipeline_mode<synchronous>, transform_indices = @transform_6, window_bounds = array<i64: 1, 32>}, {pipeline_mode = #tpu.pipeline_mode<synchronous>, transform_indices = @transform_7, window_bounds = array<i64: 1, 32>}, {pipeline_mode = #tpu.pipeline_mode<synchronous>, transform_indices = @transform_8, window_bounds = array<i64: 1, 32>}, {pipeline_mode = #tpu.pipeline_mode<synchronous>, transform_indices = @transform_9, window_bounds = array<i64: 32, 128>}, {pipeline_mode = #tpu.pipeline_mode<synchronous>, transform_indices = @transform_10, window_bounds = array<i64: 1, 128>}, {pipeline_mode = #tpu.pipeline_mode<synchronous>, transform_indices = @transform_11, window_bounds = array<i64: 128, 32>}, {pipeline_mode = #tpu.pipeline_mode<synchronous>, transform_indices = @transform_12, window_bounds = array<i64: 1, 32>}, {transform_indices = @transform_13, window_bounds = array<i64: 2, 8, 32>}]} {
    %c0 = arith.constant 0 : index
    %c0_0 = arith.constant 0 : index
    %c0_1 = arith.constant 0 : index
    %0 = vector.load %arg1[%c0, %c0_0, %c0_1] : memref<2x8x32xf32, #tpu.memory_space<vmem>>, vector<2x8x32xf32>
    %1 = vector.shape_cast %0 : vector<2x8x32xf32> to vector<16x32xf32>
    %c0_2 = arith.constant 0 : index
    %c0_3 = arith.constant 0 : index
    %2 = vector.load %arg2[%c0_2, %c0_3] : memref<1x32xf32, #tpu.memory_space<vmem>>, vector<1x32xf32>
    %3 = vector.shape_cast %2 : vector<1x32xf32> to vector<32xf32>
    %c0_4 = arith.constant 0 : index
    %c0_5 = arith.constant 0 : index
    %4 = vector.load %arg3[%c0_4, %c0_5] : memref<1x32xf32, #tpu.memory_space<vmem>>, vector<1x32xf32>
    %5 = vector.shape_cast %4 : vector<1x32xf32> to vector<32xf32>
    %cst = arith.constant dense<0.000000e+00> : vector<16xf32>
    %6 = vector.multi_reduction <add>, %1, %cst [1] : vector<16x32xf32> to vector<16xf32>
    %7 = vector.shape_cast %6 : vector<16xf32> to vector<16x1xf32>
    %cst_6 = arith.constant 3.200000e+01 : f32
    %8 = vector.broadcast %cst_6 : f32 to vector<16x1xf32>
    %9 = arith.divf %7, %8 : vector<16x1xf32>
    %10 = vector.broadcast %9 : vector<16x1xf32> to vector<16x32xf32>
    %11 = arith.subf %1, %10 : vector<16x32xf32>
    %12 = arith.mulf %11, %11 : vector<16x32xf32>
    %cst_7 = arith.constant dense<0.000000e+00> : vector<16xf32>
    %13 = vector.multi_reduction <add>, %12, %cst_7 [1] : vector<16x32xf32> to vector<16xf32>
    %14 = vector.shape_cast %13 : vector<16xf32> to vector<16x1xf32>
    %cst_8 = arith.constant 3.200000e+01 : f32
    %15 = vector.broadcast %cst_8 : f32 to vector<16x1xf32>
    %16 = arith.divf %14, %15 : vector<16x1xf32>
    %cst_9 = arith.constant 9.99999974E-6 : f32
    %17 = vector.broadcast %cst_9 : f32 to vector<16x1xf32>
    %18 = arith.addf %16, %17 : vector<16x1xf32>
    %19 = math.rsqrt %18 : vector<16x1xf32>
    %20 = vector.broadcast %19 : vector<16x1xf32> to vector<16x32xf32>
    %21 = arith.mulf %11, %20 : vector<16x32xf32>
    %22 = vector.shape_cast %3 : vector<32xf32> to vector<1x32xf32>
    %23 = vector.broadcast %22 : vector<1x32xf32> to vector<16x32xf32>
    %24 = arith.mulf %21, %23 : vector<16x32xf32>
    %25 = vector.shape_cast %5 : vector<32xf32> to vector<1x32xf32>
    %26 = vector.broadcast %25 : vector<1x32xf32> to vector<16x32xf32>
    %27 = arith.addf %24, %26 : vector<16x32xf32>
    %28 = arith.truncf %27 : vector<16x32xf32> to vector<16x32xbf16>
    %c0_10 = arith.constant 0 : index
    %c0_11 = arith.constant 0 : index
    %29 = vector.load %arg4[%c0_10, %c0_11] : memref<32x96xbf16, #tpu.memory_space<vmem>>, vector<32x96xbf16>
    %cst_12 = arith.constant dense<0.000000e+00> : vector<16x96xf32>
    %30 = tpu.matmul %28, %29, %cst_12 {dimension_numbers = #tpu.dot_dimension_numbers<[1], [0], [0], [1], [0, 0, 1, 1], [], []>} : vector<16x32xbf16>, vector<32x96xbf16>, vector<16x96xf32> -> vector<16x96xf32>
    %c0_13 = arith.constant 0 : index
    %c0_14 = arith.constant 0 : index
    %31 = vector.load %arg5[%c0_13, %c0_14] : memref<1x96xf32, #tpu.memory_space<vmem>>, vector<1x96xf32>
    %32 = vector.shape_cast %31 : vector<1x96xf32> to vector<96xf32>
    %33 = vector.shape_cast %32 : vector<96xf32> to vector<1x96xf32>
    %34 = vector.broadcast %33 : vector<1x96xf32> to vector<16x96xf32>
    %35 = arith.addf %30, %34 : vector<16x96xf32>
    %36 = vector.extract_strided_slice %35 {offsets = [0, 0], sizes = [16, 32], strides = [1, 1]} : vector<16x96xf32> to vector<16x32xf32>
    %37 = vector.shape_cast %36 : vector<16x32xf32> to vector<2x8x32xf32>
    %38 = vector.extract_strided_slice %35 {offsets = [0, 32], sizes = [16, 32], strides = [1, 1]} : vector<16x96xf32> to vector<16x32xf32>
    %39 = vector.shape_cast %38 : vector<16x32xf32> to vector<2x8x32xf32>
    %40 = vector.extract_strided_slice %35 {offsets = [0, 64], sizes = [16, 32], strides = [1, 1]} : vector<16x96xf32> to vector<16x32xf32>
    %41 = vector.shape_cast %40 : vector<16x32xf32> to vector<2x8x32xf32>
    %42 = tpu.iota {dimensions = array<i32: 0>} : vector<8x8xi32>
    %43 = tpu.iota {dimensions = array<i32: 1>} : vector<8x8xi32>
    %44 = arith.cmpi sge, %42, %43 : vector<8x8xi32>
    %cst_15 = arith.constant 0.000000e+00 : f32
    %cst_16 = arith.constant -1.000000e+30 : f32
    %45 = vector.broadcast %cst_15 : f32 to vector<8x8xf32>
    %46 = vector.broadcast %cst_16 : f32 to vector<8x8xf32>
    %47 = arith.select %44, %45, %46 : vector<8x8xi1>, vector<8x8xf32>
    %cst_17 = arith.constant 0.000000e+00 : f32
    %48 = vector.broadcast %cst_17 : f32 to vector<16x32xf32>
    %49 = vector.extract_strided_slice %37 {offsets = [0, 0, 0], sizes = [2, 8, 8], strides = [1, 1, 1]} : vector<2x8x32xf32> to vector<2x8x8xf32>
    %50 = arith.truncf %49 : vector<2x8x8xf32> to vector<2x8x8xbf16>
    %51 = vector.extract_strided_slice %39 {offsets = [0, 0, 0], sizes = [2, 8, 8], strides = [1, 1, 1]} : vector<2x8x32xf32> to vector<2x8x8xf32>
    %52 = arith.truncf %51 : vector<2x8x8xf32> to vector<2x8x8xbf16>
    %53 = vector.extract_strided_slice %41 {offsets = [0, 0, 0], sizes = [2, 8, 8], strides = [1, 1, 1]} : vector<2x8x32xf32> to vector<2x8x8xf32>
    %54 = arith.truncf %53 : vector<2x8x8xf32> to vector<2x8x8xbf16>
    "tpu.trace_start"() <{level = 10 : i32, message = "bqd,bkd->bqk"}> : () -> ()
    %cst_18 = arith.constant dense<0.000000e+00> : vector<2x8x8xf32>
    %55 = tpu.matmul %50, %52, %cst_18 {dimension_numbers = #tpu.dot_dimension_numbers<[2], [2], [1], [1], [0, 0, 0, 1, 1, 1], [0], [0]>} : vector<2x8x8xbf16>, vector<2x8x8xbf16>, vector<2x8x8xf32> -> vector<2x8x8xf32>
    "tpu.trace_stop"() : () -> ()
    %56 = vector.shape_cast %47 : vector<8x8xf32> to vector<1x8x8xf32>
    %57 = vector.broadcast %56 : vector<1x8x8xf32> to vector<2x8x8xf32>
    %58 = arith.addf %55, %57 : vector<2x8x8xf32>
    %cst_19 = arith.constant dense<0xFF800000> : vector<2x8xf32>
    %59 = vector.multi_reduction <maximumf>, %58, %cst_19 [2] : vector<2x8x8xf32> to vector<2x8xf32>
    %60 = vector.shape_cast %59 : vector<2x8xf32> to vector<2x8x1xf32>
    %61 = vector.broadcast %60 : vector<2x8x1xf32> to vector<2x8x8xf32>
    %62 = arith.subf %58, %61 : vector<2x8x8xf32>
    %63 = math.exp %62 : vector<2x8x8xf32>
    %cst_20 = arith.constant dense<0.000000e+00> : vector<2x8xf32>
    %64 = vector.multi_reduction <add>, %63, %cst_20 [2] : vector<2x8x8xf32> to vector<2x8xf32>
    %65 = vector.shape_cast %64 : vector<2x8xf32> to vector<2x8x1xf32>
    %66 = tpu.reciprocal %65 {approx = true} : vector<2x8x1xf32> -> vector<2x8x1xf32>
    %67 = vector.broadcast %66 : vector<2x8x1xf32> to vector<2x8x8xf32>
    %68 = arith.mulf %63, %67 : vector<2x8x8xf32>
    %69 = arith.truncf %68 : vector<2x8x8xf32> to vector<2x8x8xbf16>
    "tpu.trace_start"() <{level = 10 : i32, message = "bqk,bkd->bqd"}> : () -> ()
    %cst_21 = arith.constant dense<0.000000e+00> : vector<2x8x8xf32>
    %70 = tpu.matmul %69, %54, %cst_21 {dimension_numbers = #tpu.dot_dimension_numbers<[2], [1], [1], [2], [0, 0, 0, 1, 1, 2], [0], [0]>} : vector<2x8x8xbf16>, vector<2x8x8xbf16>, vector<2x8x8xf32> -> vector<2x8x8xf32>
    "tpu.trace_stop"() : () -> ()
    %71 = vector.shape_cast %70 : vector<2x8x8xf32> to vector<16x8xf32>
    %72 = arith.truncf %71 : vector<16x8xf32> to vector<16x8xbf16>
    %c0_22 = arith.constant 0 : index
    %c0_23 = arith.constant 0 : index
    %c0_24 = arith.constant 0 : index
    %73 = vector.load %arg6[%c0_22, %c0_23, %c0_24] : memref<4x8x32xbf16, #tpu.memory_space<vmem>>, vector<1x8x32xbf16>
    %74 = vector.shape_cast %73 : vector<1x8x32xbf16> to vector<8x32xbf16>
    %cst_25 = arith.constant dense<0.000000e+00> : vector<16x32xf32>
    %75 = tpu.matmul %72, %74, %cst_25 {dimension_numbers = #tpu.dot_dimension_numbers<[1], [0], [0], [1], [0, 0, 1, 1], [], []>} : vector<16x8xbf16>, vector<8x32xbf16>, vector<16x32xf32> -> vector<16x32xf32>
    %76 = arith.addf %48, %75 : vector<16x32xf32>
    %77 = vector.extract_strided_slice %37 {offsets = [0, 0, 8], sizes = [2, 8, 8], strides = [1, 1, 1]} : vector<2x8x32xf32> to vector<2x8x8xf32>
    %78 = arith.truncf %77 : vector<2x8x8xf32> to vector<2x8x8xbf16>
    %79 = vector.extract_strided_slice %39 {offsets = [0, 0, 8], sizes = [2, 8, 8], strides = [1, 1, 1]} : vector<2x8x32xf32> to vector<2x8x8xf32>
    %80 = arith.truncf %79 : vector<2x8x8xf32> to vector<2x8x8xbf16>
    %81 = vector.extract_strided_slice %41 {offsets = [0, 0, 8], sizes = [2, 8, 8], strides = [1, 1, 1]} : vector<2x8x32xf32> to vector<2x8x8xf32>
    %82 = arith.truncf %81 : vector<2x8x8xf32> to vector<2x8x8xbf16>
    "tpu.trace_start"() <{level = 10 : i32, message = "bqd,bkd->bqk"}> : () -> ()
    %cst_26 = arith.constant dense<0.000000e+00> : vector<2x8x8xf32>
    %83 = tpu.matmul %78, %80, %cst_26 {dimension_numbers = #tpu.dot_dimension_numbers<[2], [2], [1], [1], [0, 0, 0, 1, 1, 1], [0], [0]>} : vector<2x8x8xbf16>, vector<2x8x8xbf16>, vector<2x8x8xf32> -> vector<2x8x8xf32>
    "tpu.trace_stop"() : () -> ()
    %84 = vector.shape_cast %47 : vector<8x8xf32> to vector<1x8x8xf32>
    %85 = vector.broadcast %84 : vector<1x8x8xf32> to vector<2x8x8xf32>
    %86 = arith.addf %83, %85 : vector<2x8x8xf32>
    %cst_27 = arith.constant dense<0xFF800000> : vector<2x8xf32>
    %87 = vector.multi_reduction <maximumf>, %86, %cst_27 [2] : vector<2x8x8xf32> to vector<2x8xf32>
    %88 = vector.shape_cast %87 : vector<2x8xf32> to vector<2x8x1xf32>
    %89 = vector.broadcast %88 : vector<2x8x1xf32> to vector<2x8x8xf32>
    %90 = arith.subf %86, %89 : vector<2x8x8xf32>
    %91 = math.exp %90 : vector<2x8x8xf32>
    %cst_28 = arith.constant dense<0.000000e+00> : vector<2x8xf32>
    %92 = vector.multi_reduction <add>, %91, %cst_28 [2] : vector<2x8x8xf32> to vector<2x8xf32>
    %93 = vector.shape_cast %92 : vector<2x8xf32> to vector<2x8x1xf32>
    %94 = tpu.reciprocal %93 {approx = true} : vector<2x8x1xf32> -> vector<2x8x1xf32>
    %95 = vector.broadcast %94 : vector<2x8x1xf32> to vector<2x8x8xf32>
    %96 = arith.mulf %91, %95 : vector<2x8x8xf32>
    %97 = arith.truncf %96 : vector<2x8x8xf32> to vector<2x8x8xbf16>
    "tpu.trace_start"() <{level = 10 : i32, message = "bqk,bkd->bqd"}> : () -> ()
    %cst_29 = arith.constant dense<0.000000e+00> : vector<2x8x8xf32>
    %98 = tpu.matmul %97, %82, %cst_29 {dimension_numbers = #tpu.dot_dimension_numbers<[2], [1], [1], [2], [0, 0, 0, 1, 1, 2], [0], [0]>} : vector<2x8x8xbf16>, vector<2x8x8xbf16>, vector<2x8x8xf32> -> vector<2x8x8xf32>
    "tpu.trace_stop"() : () -> ()
    %99 = vector.shape_cast %98 : vector<2x8x8xf32> to vector<16x8xf32>
    %100 = arith.truncf %99 : vector<16x8xf32> to vector<16x8xbf16>
    %c1 = arith.constant 1 : index
    %c0_30 = arith.constant 0 : index
    %c0_31 = arith.constant 0 : index
    %101 = vector.load %arg6[%c1, %c0_30, %c0_31] : memref<4x8x32xbf16, #tpu.memory_space<vmem>>, vector<1x8x32xbf16>
    %102 = vector.shape_cast %101 : vector<1x8x32xbf16> to vector<8x32xbf16>
    %cst_32 = arith.constant dense<0.000000e+00> : vector<16x32xf32>
    %103 = tpu.matmul %100, %102, %cst_32 {dimension_numbers = #tpu.dot_dimension_numbers<[1], [0], [0], [1], [0, 0, 1, 1], [], []>} : vector<16x8xbf16>, vector<8x32xbf16>, vector<16x32xf32> -> vector<16x32xf32>
    %104 = arith.addf %76, %103 : vector<16x32xf32>
    %105 = vector.extract_strided_slice %37 {offsets = [0, 0, 16], sizes = [2, 8, 8], strides = [1, 1, 1]} : vector<2x8x32xf32> to vector<2x8x8xf32>
    %106 = arith.truncf %105 : vector<2x8x8xf32> to vector<2x8x8xbf16>
    %107 = vector.extract_strided_slice %39 {offsets = [0, 0, 16], sizes = [2, 8, 8], strides = [1, 1, 1]} : vector<2x8x32xf32> to vector<2x8x8xf32>
    %108 = arith.truncf %107 : vector<2x8x8xf32> to vector<2x8x8xbf16>
    %109 = vector.extract_strided_slice %41 {offsets = [0, 0, 16], sizes = [2, 8, 8], strides = [1, 1, 1]} : vector<2x8x32xf32> to vector<2x8x8xf32>
    %110 = arith.truncf %109 : vector<2x8x8xf32> to vector<2x8x8xbf16>
    "tpu.trace_start"() <{level = 10 : i32, message = "bqd,bkd->bqk"}> : () -> ()
    %cst_33 = arith.constant dense<0.000000e+00> : vector<2x8x8xf32>
    %111 = tpu.matmul %106, %108, %cst_33 {dimension_numbers = #tpu.dot_dimension_numbers<[2], [2], [1], [1], [0, 0, 0, 1, 1, 1], [0], [0]>} : vector<2x8x8xbf16>, vector<2x8x8xbf16>, vector<2x8x8xf32> -> vector<2x8x8xf32>
    "tpu.trace_stop"() : () -> ()
    %112 = vector.shape_cast %47 : vector<8x8xf32> to vector<1x8x8xf32>
    %113 = vector.broadcast %112 : vector<1x8x8xf32> to vector<2x8x8xf32>
    %114 = arith.addf %111, %113 : vector<2x8x8xf32>
    %cst_34 = arith.constant dense<0xFF800000> : vector<2x8xf32>
    %115 = vector.multi_reduction <maximumf>, %114, %cst_34 [2] : vector<2x8x8xf32> to vector<2x8xf32>
    %116 = vector.shape_cast %115 : vector<2x8xf32> to vector<2x8x1xf32>
    %117 = vector.broadcast %116 : vector<2x8x1xf32> to vector<2x8x8xf32>
    %118 = arith.subf %114, %117 : vector<2x8x8xf32>
    %119 = math.exp %118 : vector<2x8x8xf32>
    %cst_35 = arith.constant dense<0.000000e+00> : vector<2x8xf32>
    %120 = vector.multi_reduction <add>, %119, %cst_35 [2] : vector<2x8x8xf32> to vector<2x8xf32>
    %121 = vector.shape_cast %120 : vector<2x8xf32> to vector<2x8x1xf32>
    %122 = tpu.reciprocal %121 {approx = true} : vector<2x8x1xf32> -> vector<2x8x1xf32>
    %123 = vector.broadcast %122 : vector<2x8x1xf32> to vector<2x8x8xf32>
    %124 = arith.mulf %119, %123 : vector<2x8x8xf32>
    %125 = arith.truncf %124 : vector<2x8x8xf32> to vector<2x8x8xbf16>
    "tpu.trace_start"() <{level = 10 : i32, message = "bqk,bkd->bqd"}> : () -> ()
    %cst_36 = arith.constant dense<0.000000e+00> : vector<2x8x8xf32>
    %126 = tpu.matmul %125, %110, %cst_36 {dimension_numbers = #tpu.dot_dimension_numbers<[2], [1], [1], [2], [0, 0, 0, 1, 1, 2], [0], [0]>} : vector<2x8x8xbf16>, vector<2x8x8xbf16>, vector<2x8x8xf32> -> vector<2x8x8xf32>
    "tpu.trace_stop"() : () -> ()
    %127 = vector.shape_cast %126 : vector<2x8x8xf32> to vector<16x8xf32>
    %128 = arith.truncf %127 : vector<16x8xf32> to vector<16x8xbf16>
    %c2 = arith.constant 2 : index
    %c0_37 = arith.constant 0 : index
    %c0_38 = arith.constant 0 : index
    %129 = vector.load %arg6[%c2, %c0_37, %c0_38] : memref<4x8x32xbf16, #tpu.memory_space<vmem>>, vector<1x8x32xbf16>
    %130 = vector.shape_cast %129 : vector<1x8x32xbf16> to vector<8x32xbf16>
    %cst_39 = arith.constant dense<0.000000e+00> : vector<16x32xf32>
    %131 = tpu.matmul %128, %130, %cst_39 {dimension_numbers = #tpu.dot_dimension_numbers<[1], [0], [0], [1], [0, 0, 1, 1], [], []>} : vector<16x8xbf16>, vector<8x32xbf16>, vector<16x32xf32> -> vector<16x32xf32>
    %132 = arith.addf %104, %131 : vector<16x32xf32>
    %133 = vector.extract_strided_slice %37 {offsets = [0, 0, 24], sizes = [2, 8, 8], strides = [1, 1, 1]} : vector<2x8x32xf32> to vector<2x8x8xf32>
    %134 = arith.truncf %133 : vector<2x8x8xf32> to vector<2x8x8xbf16>
    %135 = vector.extract_strided_slice %39 {offsets = [0, 0, 24], sizes = [2, 8, 8], strides = [1, 1, 1]} : vector<2x8x32xf32> to vector<2x8x8xf32>
    %136 = arith.truncf %135 : vector<2x8x8xf32> to vector<2x8x8xbf16>
    %137 = vector.extract_strided_slice %41 {offsets = [0, 0, 24], sizes = [2, 8, 8], strides = [1, 1, 1]} : vector<2x8x32xf32> to vector<2x8x8xf32>
    %138 = arith.truncf %137 : vector<2x8x8xf32> to vector<2x8x8xbf16>
    "tpu.trace_start"() <{level = 10 : i32, message = "bqd,bkd->bqk"}> : () -> ()
    %cst_40 = arith.constant dense<0.000000e+00> : vector<2x8x8xf32>
    %139 = tpu.matmul %134, %136, %cst_40 {dimension_numbers = #tpu.dot_dimension_numbers<[2], [2], [1], [1], [0, 0, 0, 1, 1, 1], [0], [0]>} : vector<2x8x8xbf16>, vector<2x8x8xbf16>, vector<2x8x8xf32> -> vector<2x8x8xf32>
    "tpu.trace_stop"() : () -> ()
    %140 = vector.shape_cast %47 : vector<8x8xf32> to vector<1x8x8xf32>
    %141 = vector.broadcast %140 : vector<1x8x8xf32> to vector<2x8x8xf32>
    %142 = arith.addf %139, %141 : vector<2x8x8xf32>
    %cst_41 = arith.constant dense<0xFF800000> : vector<2x8xf32>
    %143 = vector.multi_reduction <maximumf>, %142, %cst_41 [2] : vector<2x8x8xf32> to vector<2x8xf32>
    %144 = vector.shape_cast %143 : vector<2x8xf32> to vector<2x8x1xf32>
    %145 = vector.broadcast %144 : vector<2x8x1xf32> to vector<2x8x8xf32>
    %146 = arith.subf %142, %145 : vector<2x8x8xf32>
    %147 = math.exp %146 : vector<2x8x8xf32>
    %cst_42 = arith.constant dense<0.000000e+00> : vector<2x8xf32>
    %148 = vector.multi_reduction <add>, %147, %cst_42 [2] : vector<2x8x8xf32> to vector<2x8xf32>
    %149 = vector.shape_cast %148 : vector<2x8xf32> to vector<2x8x1xf32>
    %150 = tpu.reciprocal %149 {approx = true} : vector<2x8x1xf32> -> vector<2x8x1xf32>
    %151 = vector.broadcast %150 : vector<2x8x1xf32> to vector<2x8x8xf32>
    %152 = arith.mulf %147, %151 : vector<2x8x8xf32>
    %153 = arith.truncf %152 : vector<2x8x8xf32> to vector<2x8x8xbf16>
    "tpu.trace_start"() <{level = 10 : i32, message = "bqk,bkd->bqd"}> : () -> ()
    %cst_43 = arith.constant dense<0.000000e+00> : vector<2x8x8xf32>
    %154 = tpu.matmul %153, %138, %cst_43 {dimension_numbers = #tpu.dot_dimension_numbers<[2], [1], [1], [2], [0, 0, 0, 1, 1, 2], [0], [0]>} : vector<2x8x8xbf16>, vector<2x8x8xbf16>, vector<2x8x8xf32> -> vector<2x8x8xf32>
    "tpu.trace_stop"() : () -> ()
    %155 = vector.shape_cast %154 : vector<2x8x8xf32> to vector<16x8xf32>
    %156 = arith.truncf %155 : vector<16x8xf32> to vector<16x8xbf16>
    %c3 = arith.constant 3 : index
    %c0_44 = arith.constant 0 : index
    %c0_45 = arith.constant 0 : index
    %157 = vector.load %arg6[%c3, %c0_44, %c0_45] : memref<4x8x32xbf16, #tpu.memory_space<vmem>>, vector<1x8x32xbf16>
    %158 = vector.shape_cast %157 : vector<1x8x32xbf16> to vector<8x32xbf16>
    %cst_46 = arith.constant dense<0.000000e+00> : vector<16x32xf32>
    %159 = tpu.matmul %156, %158, %cst_46 {dimension_numbers = #tpu.dot_dimension_numbers<[1], [0], [0], [1], [0, 0, 1, 1], [], []>} : vector<16x8xbf16>, vector<8x32xbf16>, vector<16x32xf32> -> vector<16x32xf32>
    %160 = arith.addf %132, %159 : vector<16x32xf32>
    %c0_47 = arith.constant 0 : index
    %c0_48 = arith.constant 0 : index
    %161 = vector.load %arg7[%c0_47, %c0_48] : memref<1x32xf32, #tpu.memory_space<vmem>>, vector<1x32xf32>
    %162 = vector.shape_cast %161 : vector<1x32xf32> to vector<32xf32>
    %163 = vector.shape_cast %162 : vector<32xf32> to vector<1x32xf32>
    %164 = vector.broadcast %163 : vector<1x32xf32> to vector<16x32xf32>
    %165 = arith.addf %160, %164 : vector<16x32xf32>
    %166 = arith.addf %1, %165 : vector<16x32xf32>
    %c0_49 = arith.constant 0 : index
    %c0_50 = arith.constant 0 : index
    %167 = vector.load %arg8[%c0_49, %c0_50] : memref<1x32xf32, #tpu.memory_space<vmem>>, vector<1x32xf32>
    %168 = vector.shape_cast %167 : vector<1x32xf32> to vector<32xf32>
    %c0_51 = arith.constant 0 : index
    %c0_52 = arith.constant 0 : index
    %169 = vector.load %arg9[%c0_51, %c0_52] : memref<1x32xf32, #tpu.memory_space<vmem>>, vector<1x32xf32>
    %170 = vector.shape_cast %169 : vector<1x32xf32> to vector<32xf32>
    %cst_53 = arith.constant dense<0.000000e+00> : vector<16xf32>
    %171 = vector.multi_reduction <add>, %166, %cst_53 [1] : vector<16x32xf32> to vector<16xf32>
    %172 = vector.shape_cast %171 : vector<16xf32> to vector<16x1xf32>
    %cst_54 = arith.constant 3.200000e+01 : f32
    %173 = vector.broadcast %cst_54 : f32 to vector<16x1xf32>
    %174 = arith.divf %172, %173 : vector<16x1xf32>
    %175 = vector.broadcast %174 : vector<16x1xf32> to vector<16x32xf32>
    %176 = arith.subf %166, %175 : vector<16x32xf32>
    %177 = arith.mulf %176, %176 : vector<16x32xf32>
    %cst_55 = arith.constant dense<0.000000e+00> : vector<16xf32>
    %178 = vector.multi_reduction <add>, %177, %cst_55 [1] : vector<16x32xf32> to vector<16xf32>
    %179 = vector.shape_cast %178 : vector<16xf32> to vector<16x1xf32>
    %cst_56 = arith.constant 3.200000e+01 : f32
    %180 = vector.broadcast %cst_56 : f32 to vector<16x1xf32>
    %181 = arith.divf %179, %180 : vector<16x1xf32>
    %cst_57 = arith.constant 9.99999974E-6 : f32
    %182 = vector.broadcast %cst_57 : f32 to vector<16x1xf32>
    %183 = arith.addf %181, %182 : vector<16x1xf32>
    %184 = math.rsqrt %183 : vector<16x1xf32>
    %185 = vector.broadcast %184 : vector<16x1xf32> to vector<16x32xf32>
    %186 = arith.mulf %176, %185 : vector<16x32xf32>
    %187 = vector.shape_cast %168 : vector<32xf32> to vector<1x32xf32>
    %188 = vector.broadcast %187 : vector<1x32xf32> to vector<16x32xf32>
    %189 = arith.mulf %186, %188 : vector<16x32xf32>
    %190 = vector.shape_cast %170 : vector<32xf32> to vector<1x32xf32>
    %191 = vector.broadcast %190 : vector<1x32xf32> to vector<16x32xf32>
    %192 = arith.addf %189, %191 : vector<16x32xf32>
    %193 = arith.truncf %192 : vector<16x32xf32> to vector<16x32xbf16>
    %c0_58 = arith.constant 0 : index
    %c0_59 = arith.constant 0 : index
    %194 = vector.load %arg10[%c0_58, %c0_59] : memref<32x128xbf16, #tpu.memory_space<vmem>>, vector<32x128xbf16>
    %cst_60 = arith.constant dense<0.000000e+00> : vector<16x128xf32>
    %195 = tpu.matmul %193, %194, %cst_60 {dimension_numbers = #tpu.dot_dimension_numbers<[1], [0], [0], [1], [0, 0, 1, 1], [], []>} : vector<16x32xbf16>, vector<32x128xbf16>, vector<16x128xf32> -> vector<16x128xf32>
    %c0_61 = arith.constant 0 : index
    %c0_62 = arith.constant 0 : index
    %196 = vector.load %arg11[%c0_61, %c0_62] : memref<1x128xf32, #tpu.memory_space<vmem>>, vector<1x128xf32>
    %197 = vector.shape_cast %196 : vector<1x128xf32> to vector<128xf32>
    %198 = vector.shape_cast %197 : vector<128xf32> to vector<1x128xf32>
    %199 = vector.broadcast %198 : vector<1x128xf32> to vector<16x128xf32>
    %200 = arith.addf %195, %199 : vector<16x128xf32>
    %cst_63 = arith.constant 5.000000e-01 : f32
    %201 = vector.broadcast %cst_63 : f32 to vector<16x128xf32>
    %202 = arith.mulf %201, %200 : vector<16x128xf32>
    %cst_64 = arith.constant 4.471500e-02 : f32
    %203 = vector.broadcast %cst_64 : f32 to vector<16x128xf32>
    %204 = arith.mulf %203, %200 : vector<16x128xf32>
    %205 = arith.mulf %204, %200 : vector<16x128xf32>
    %206 = arith.mulf %205, %200 : vector<16x128xf32>
    %207 = arith.addf %200, %206 : vector<16x128xf32>
    %cst_65 = arith.constant 0.797884583 : f32
    %208 = vector.broadcast %cst_65 : f32 to vector<16x128xf32>
    %209 = arith.mulf %208, %207 : vector<16x128xf32>
    %210 = math.tanh %209 : vector<16x128xf32>
    %cst_66 = arith.constant 1.000000e+00 : f32
    %211 = vector.broadcast %cst_66 : f32 to vector<16x128xf32>
    %212 = arith.addf %211, %210 : vector<16x128xf32>
    %213 = arith.mulf %202, %212 : vector<16x128xf32>
    %214 = arith.truncf %213 : vector<16x128xf32> to vector<16x128xbf16>
    %c0_67 = arith.constant 0 : index
    %c0_68 = arith.constant 0 : index
    %215 = vector.load %arg12[%c0_67, %c0_68] : memref<128x32xbf16, #tpu.memory_space<vmem>>, vector<128x32xbf16>
    %cst_69 = arith.constant dense<0.000000e+00> : vector<16x32xf32>
    %216 = tpu.matmul %214, %215, %cst_69 {dimension_numbers = #tpu.dot_dimension_numbers<[1], [0], [0], [1], [0, 0, 1, 1], [], []>} : vector<16x128xbf16>, vector<128x32xbf16>, vector<16x32xf32> -> vector<16x32xf32>
    %c0_70 = arith.constant 0 : index
    %c0_71 = arith.constant 0 : index
    %217 = vector.load %arg13[%c0_70, %c0_71] : memref<1x32xf32, #tpu.memory_space<vmem>>, vector<1x32xf32>
    %218 = vector.shape_cast %217 : vector<1x32xf32> to vector<32xf32>
    %219 = vector.shape_cast %218 : vector<32xf32> to vector<1x32xf32>
    %220 = vector.broadcast %219 : vector<1x32xf32> to vector<16x32xf32>
    %221 = arith.addf %216, %220 : vector<16x32xf32>
    %222 = arith.addf %166, %221 : vector<16x32xf32>
    %223 = vector.shape_cast %222 : vector<16x32xf32> to vector<2x8x32xf32>
    %c0_72 = arith.constant 0 : index
    %c0_73 = arith.constant 0 : index
    %c0_74 = arith.constant 0 : index
    %224 = vector.load %arg14[%c0_72, %c0_73, %c0_74] : memref<2x8x32xf32, #tpu.memory_space<vmem>>, vector<2x8x32xf32>
    tpu.vector_store %arg14[%c0_72, %c0_73, %c0_74], %223 {strides = array<i32>} : memref<2x8x32xf32, #tpu.memory_space<vmem>>, vector<2x8x32xf32>,
    return
  }
  func.func @transform_0(%arg0: i32) -> (i32, i32, i32) {
    %c0_i32 = arith.constant 0 : i32
    %c0_i32_0 = arith.constant 0 : i32
    %c0_i32_1 = arith.constant 0 : i32
    return %arg0, %c0_i32, %c0_i32_0 : i32, i32, i32
  }
  func.func @transform_1(%arg0: i32) -> (i32, i32) {
    %c0_i32 = arith.constant 0 : i32
    %c0_i32_0 = arith.constant 0 : i32
    %c0_i32_1 = arith.constant 0 : i32
    return %c0_i32, %c0_i32_0 : i32, i32
  }
  func.func @transform_2(%arg0: i32) -> (i32, i32) {
    %c0_i32 = arith.constant 0 : i32
    %c0_i32_0 = arith.constant 0 : i32
    %c0_i32_1 = arith.constant 0 : i32
    return %c0_i32, %c0_i32_0 : i32, i32
  }
  func.func @transform_3(%arg0: i32) -> (i32, i32) {
    %c0_i32 = arith.constant 0 : i32
    %c0_i32_0 = arith.constant 0 : i32
    %c0_i32_1 = arith.constant 0 : i32
    return %c0_i32, %c0_i32_0 : i32, i32
  }
  func.func @transform_4(%arg0: i32) -> (i32, i32) {
    %c0_i32 = arith.constant 0 : i32
    %c0_i32_0 = arith.constant 0 : i32
    %c0_i32_1 = arith.constant 0 : i32
    return %c0_i32, %c0_i32_0 : i32, i32
  }
  func.func @transform_5(%arg0: i32) -> (i32, i32, i32) {
    %c0_i32 = arith.constant 0 : i32
    %c0_i32_0 = arith.constant 0 : i32
    %c0_i32_1 = arith.constant 0 : i32
    %c0_i32_2 = arith.constant 0 : i32
    return %c0_i32, %c0_i32_0, %c0_i32_1 : i32, i32, i32
  }
  func.func @transform_6(%arg0: i32) -> (i32, i32) {
    %c0_i32 = arith.constant 0 : i32
    %c0_i32_0 = arith.constant 0 : i32
    %c0_i32_1 = arith.constant 0 : i32
    return %c0_i32, %c0_i32_0 : i32, i32
  }
  func.func @transform_7(%arg0: i32) -> (i32, i32) {
    %c0_i32 = arith.constant 0 : i32
    %c0_i32_0 = arith.constant 0 : i32
    %c0_i32_1 = arith.constant 0 : i32
    return %c0_i32, %c0_i32_0 : i32, i32
  }
  func.func @transform_8(%arg0: i32) -> (i32, i32) {
    %c0_i32 = arith.constant 0 : i32
    %c0_i32_0 = arith.constant 0 : i32
    %c0_i32_1 = arith.constant 0 : i32
    return %c0_i32, %c0_i32_0 : i32, i32
  }
  func.func @transform_9(%arg0: i32) -> (i32, i32) {
    %c0_i32 = arith.constant 0 : i32
    %c0_i32_0 = arith.constant 0 : i32
    %c0_i32_1 = arith.constant 0 : i32
    return %c0_i32, %c0_i32_0 : i32, i32
  }
  func.func @transform_10(%arg0: i32) -> (i32, i32) {
    %c0_i32 = arith.constant 0 : i32
    %c0_i32_0 = arith.constant 0 : i32
    %c0_i32_1 = arith.constant 0 : i32
    return %c0_i32, %c0_i32_0 : i32, i32
  }
  func.func @transform_11(%arg0: i32) -> (i32, i32) {
    %c0_i32 = arith.constant 0 : i32
    %c0_i32_0 = arith.constant 0 : i32
    %c0_i32_1 = arith.constant 0 : i32
    return %c0_i32, %c0_i32_0 : i32, i32
  }
  func.func @transform_12(%arg0: i32) -> (i32, i32) {
    %c0_i32 = arith.constant 0 : i32
    %c0_i32_0 = arith.constant 0 : i32
    %c0_i32_1 = arith.constant 0 : i32
    return %c0_i32, %c0_i32_0 : i32, i32
  }
  func.func @transform_13(%arg0: i32) -> (i32, i32, i32) {
    %c0_i32 = arith.constant 0 : i32
    %c0_i32_0 = arith.constant 0 : i32
    %c0_i32_1 = arith.constant 0 : i32
    return %arg0, %c0_i32, %c0_i32_0 : i32, i32, i32
  }
}

</mosaic_0001>

<bundles_post_ra>
// kernel: tpu_custom_call.1
= control target key start
LH: loop header
LB: loop body
LE: loop exit
PB: predicated region body
PF: predicated region fallthrough
CT: control target
= control target key end

     0   :  { %vm50_vm0 = vcmask 261120   ;;  %s2280_s0 = inlined_call_operand.vmem [shape: f32[2,8,32], index: 0, kind: input, shape index: {}]   ;;  %s2281_s1 = inlined_call_operand.vmem [shape: f32[1,32], index: 1, kind: input, shape index: {}]   ;;  %s2282_s2 = inlined_call_operand.vmem [shape: f32[1,32], index: 2, kind: input, shape index: {}]   ;;  %s2283_s3 = inlined_call_operand.vmem [shape: bf16[32,96], index: 3, kind: input, shape index: {}]   ;;  %s2284_s4 = inlined_call_operand.vmem [shape: f32[1,96], index: 4, kind: input, shape index: {}]   ;;  %s2285_s5 = inlined_call_operand.vmem [shape: bf16[4,8,32], index: 5, kind: input, shape index: {}]   ;;  %s2286_s6 = inlined_call_operand.vmem [shape: f32[1,32], index: 6, kind: input, shape index: {}]   ;;  %s2287_s7 = inlined_call_operand.vmem [shape: f32[1,32], index: 7, kind: input, shape index: {}]   ;;  %s2288_s8 = inlined_call_operand.vmem [shape: f32[1,32], index: 8, kind: input, shape index: {}]   ;;  %s2289_s9 = inlined_call_operand.vmem [shape: bf16[32,128], index: 9, kind: input, shape index: {}]   ;;  %s2290_s10 = inlined_call_operand.vmem [shape: f32[1,128], index: 10, kind: input, shape index: {}]   ;;  %s2291_s11 = inlined_call_operand.vmem [shape: bf16[128,32], index: 11, kind: input, shape index: {}]   ;;  %s2292_s12 = inlined_call_operand.vmem [shape: f32[1,32], index: 12, kind: input, shape index: {}]   ;;  %s2293_s13 = inlined_call_operand.hbm [shape: f32[2,8,32], index: 13, kind: output, shape index: {}]  }
   0x1   :  { %v1970_v0 = vld [vmem:[%s2280_s0] sm:$0xff]  ;;  %v1975_v1 = vld [vmem:[%s2280_s0 + $0x8] sm:$0xff] }
   0x2   :  { %v51_v2 = vsel %vm50_vm0, %v1970_v0, 0.0  ;;  %v54_v3 = vsel %vm50_vm0, %v1975_v1, 0.0 }
   0x3   :  { %52 = vadd.xlane.f32.xlu0 %v51_v2 }
   0x7   :  { %55 = vadd.xlane.f32.xlu0 %v54_v3 }
   0x8   :  { %18 = vsyncpa [#allocation3], 0  ;;  %v1800_v14 = vld [vmem:[%s2283_s3] sm:$0xff]   ;;  %v1880_v15 = vmov 0.0   ;;  %v1801_v16 = vld [vmem:[%s2283_s3 + $0x8] sm:$0xff]   ;;  %vm1881_vm1 = vmmov 0   ;;  %v162_v47 = vlaneseq }
   0x9   :  { %1627 = vmatprep.subr.bf16.mxu1 %v1880_v15  ;;  %1653 = vmatprep.subr.bf16.mxu0 %v1880_v15  ;;  %v1527_v25 = vld [vmem:[%s2281_s1] ss:$0 sm:$0xff]  ;;  %s1882_s1 = smov 96   ;;  %vm173_vm2 = vcmask 64512   ;;  %v1883_v50 = vmov -1e+30  }
   0xa   :  { %1628 = vmatpush3.bf16.msra.mxu1 %v1800_v14  ;;  %1631 = vmatprep.mubr.msk.bf16.mxu1 %vm1881_vm1, %v1880_v15  ;;  %v1528_v29 = vld [vmem:[%s2282_s2] ss:$0 sm:$0xff]  ;;  %v163_v48 = vshrl.u32 %v162_v47, 7  ;;  %v165_v49 = vand.u32 127, %v162_v47  ;;  %s1884_s2 = smov 64   ;;  %vm298_vm4 = vcmask 1043456  }
   0xb   :  { %1629 = vmatprep.subr.bf16.mxu1 %v1880_v15  ;;  %1655 = vmatprep.mubr.msk.bf16.mxu0 %vm1881_vm1, %v1880_v15  ;;  %v1529_v34 = vld [vmem:[%s2284_s4] ss:$0 sm:$0xff]  ;;  %s1885_s4 = smov 88   ;;  %s1886_s20 = smov 120  }
   0xc   :  { %vm166_vm3 = vcmp.ge.s32.totalorder %v163_v48, %v165_v49  ;;  %s1887_s21 = smov 56   ;;  %s1888_s22 = smov 80  }
   0xd   :  { %v2029_v51 = vsel %vm166_vm3, 0.0, %v1883_v50  ;;  %s1889_s23 = smov 112   ;;  %s1890_s28 = smov 48  }
   0xe   :  { %1630 = vmatpush3.bf16.msra.mxu1 %v1801_v16  ;;  %s1891_s0 = smov 72   ;;  %s1892_s29 = smov 104  }
   0xf   :  { %1635 = vmatprep.subr.bf16.mxu1 %v1880_v15  ;;  %s1893_s3 = smov 40   ;;  %s1894_s17 = smov [#allocation2]  }
  0x90   :  { %v53_v4 = vpop.xlane.xlu0 %52 }
  0x91   :  { %v58_v5 = vmul.f32 0.03125, %v53_v4 }
  0x93   :  { %v60_v6 = vsub.f32 %v1970_v0, %v58_v5 }
  0x94   :  { %v56_v7 = vpop.xlane.xlu0 %55 }
  0x95   :  { %v59_v8 = vmul.f32 0.03125, %v56_v7  ;;  %v62_v9 = vmul.f32 %v60_v6, %v60_v6 }
  0x97   :  { %v61_v10 = vsub.f32 %v1975_v1, %v59_v8  ;;  %v64_v11 = vsel %vm50_vm0, %v62_v9, 0.0 }
  0x98   :  { %65 = vadd.xlane.f32.xlu1 %v64_v11 }
  0x99   :  { %v63_v12 = vmul.f32 %v61_v10, %v61_v10 }
  0x9b   :  { %v67_v13 = vsel %vm50_vm0, %v63_v12, 0.0 }
  0x9c   :  { %68 = vadd.xlane.f32.xlu1 %v67_v13 }
 0x125   :  { %v66_v17 = vpop.xlane.xlu1 %65 }
 0x126   :  { %v70_v18 = vmul.f32 0.03125, %v66_v17 }
 0x128   :  { %v72_v19 = vadd.f32 1e-05, %v70_v18 }
 0x129   :  { %v69_v20 = vpop.xlane.xlu1 %68 }
 0x12a   :  { %1812 = vrsqrt.f32 %v72_v19  ;;  %v71_v21 = vmul.f32 0.03125, %v69_v20 }
 0x12c   :  { %v73_v22 = vadd.f32 1e-05, %v71_v21 }
 0x12e   :  { %1814 = vrsqrt.f32 %v73_v22 }
 0x134   :  { %v1813_v23 = vpop.eup %1812 }
 0x135   :  { %v76_v24 = vmul.f32 %v1813_v23, %v60_v6 }
 0x137   :  { %v84_v28 = vmul.f32 %v1527_v25, %v76_v24 }
 0x138   :  { %v1815_v26 = vpop.eup %1814 }
 0x139   :  { %v77_v27 = vmul.f32 %v1815_v26, %v61_v10  ;;  %v92_v31 = vadd.f32 %v1528_v29, %v84_v28 }
 0x13b   :  { %v85_v30 = vmul.f32 %v1527_v25, %v77_v27 }
 0x13d   :  { %v93_v32 = vadd.f32 %v1528_v29, %v85_v30 }
 0x13f   :  { %v94_v33 = vpack.c.bf16 %v93_v32, %v92_v31 }
 0x141   :  { %1632 = vmatmul.mubr.msk.bf16.vlgmr.msra.gmra.mrb[0].mxu1 %vm50_vm0, %v94_v33 }
 0x142   :  { %1637 = vmatprep.mubr.msk.bf16.mxu1 %vm1881_vm1, %v1880_v15 }
 0x214   :  { %v155_v35 = vpop.f32.mrb[0].mxu1 }
 0x215   :  { %v156_v36 = vadd.f32 %v1529_v34, %v155_v35  ;;  %v1633_v37 = vpop.f32.mrb[1].mxu1 }
 0x216   :  { %v158_v38 = vpop.f32.mrb[2].mxu1 }
 0x217   :  { %v2011_v39 = vpack.c.bf16 %v156_v36, %v156_v36  ;;  %v159_v40 = vadd.f32 %v1529_v34, %v158_v38  ;;  %v1634_v41 = vpop.f32.mrb[3].mxu1 }
 0x219   :  { %v2013_v42 = vpack.c.bf16 %v159_v40, %v159_v40  ;;  %171 = vrot.lane.b32.xlu0 %v2011_v39, %s1882_s1 }
 0x21b   :  { %221 = vrot.lane.b32.xlu1 %v2013_v42, %s1882_s1 }
 0x28b   :  { %v172_v43 = vpop.permute.xlu0 %171 }
 0x28c   :  { %v178_v44 = vsel %vm173_vm2, %v172_v43, 0 }
 0x28d   :  { %1636 = vmatpush3.bf16.xpose.msra.mxu1 %v178_v44  ;;  %v222_v45 = vpop.permute.xlu1 %221 }
 0x28e   :  { %1641 = vmatprep.subr.bf16.mxu1 %v1880_v15  ;;  %v227_v46 = vsel %vm173_vm2, %v222_v45, 0 }
 0x294   :  { %1638 = vmatmul.mubr.msk.bf16.vlgmr.msra.gmra.mrb[4].mxu1 %vm173_vm2, %v2011_v39 }
 0x295   :  { %1642 = vmatpush3.bf16.xpose.msra.mxu1 %v227_v46  ;;  %1643 = vmatprep.mubr.msk.bf16.mxu1 %vm1881_vm1, %v1880_v15 }
 0x296   :  { %1647 = vmatprep.subr.bf16.mxu1 %v1880_v15 }
 0x29c   :  { %1644 = vmatmul.mubr.msk.bf16.vlgmr.msra.gmra.mrb[8].mxu1 %vm173_vm2, %v2013_v42 }
 0x29d   :  { %1649 = vmatprep.mubr.msk.bf16.mxu1 %vm1881_vm1, %v1880_v15 }
 0x367   :  { %v214_v52 = vpop.f32.mrb[4].mxu1 }
 0x368   :  { %v215_v53 = vadd.f32 %v214_v52, %v2029_v51  ;;  %v1639_v54 = vpop.f32.mrb[5].mxu1 }
 0x369   :  { %v217_v55 = vpop.f32.mrb[6].mxu1 }
 0x36a   :  { %v1640_v56 = vpop.f32.mrb[7].mxu1  ;;  %v269_v57 = vsel %vm173_vm2, %v215_v53, -inf }
 0x36b   :  { %270 = vmax.xlane.f32.xlu1 %v269_v57 }
 0x36f   :  { %v263_v58 = vpop.f32.mrb[8].mxu1 }
 0x370   :  { %v264_v59 = vadd.f32 %v263_v58, %v2029_v51  ;;  %v1645_v60 = vpop.f32.mrb[9].mxu1 }
 0x371   :  { %v266_v61 = vpop.f32.mrb[10].mxu1 }
 0x372   :  { %v1646_v62 = vpop.f32.mrb[11].mxu1  ;;  %v272_v63 = vsel %vm173_vm2, %v264_v59, -inf }
 0x373   :  { %273 = vmax.xlane.f32.xlu0 %v272_v63 }
 0x37c   :  { %342 = vrot.lane.b32.xlu1 %v2013_v42, %s1884_s2 }
 0x380   :  { %394 = vrot.lane.b32.xlu1 %v2011_v39, %s1885_s4 }
 0x3f8   :  { %v271_v2 = vpop.xlane.xlu1 %270 }
 0x3f9   :  { %v275_v3 = vsub.f32 %v215_v53, %v271_v2 }
 0x3fb   :  { %v277_v4 = vmul.f32 1.442695, %v275_v3 }
 0x3fc   :  { %v343_v5 = vpop.permute.xlu1 %342 }
 0x3fd   :  { %1816 = vpow2.f32 %v277_v4  ;;  %v348_v6 = vsel %vm298_vm4, %v343_v5, 0 }
 0x3fe   :  { %1654 = vmatpush3.bf16.msra.mxu0 %v348_v6 }
 0x3ff   :  { %1665 = vmatprep.subr.bf16.mxu0 %v1880_v15 }
 0x400   :  { %v274_v7 = vpop.xlane.xlu0 %273  ;;  %v395_v16 = vpop.permute.xlu1 %394 }
 0x401   :  { %v276_v8 = vsub.f32 %v264_v59, %v274_v7  ;;  %v400_v23 = vsel %vm173_vm2, %v395_v16, 0 }
 0x403   :  { %v279_v9 = vmul.f32 1.442695, %v276_v8 }
 0x405   :  { %1818 = vpow2.f32 %v279_v9 }
 0x407   :  { %v1817_v10 = vpop.eup %1816 }
 0x408   :  { %v281_v11 = vsel %vm173_vm2, %v1817_v10, 0.0 }
 0x409   :  { %282 = vadd.xlane.f32.xlu0 %v281_v11 }
 0x40f   :  { %v1819_v12 = vpop.eup %1818 }
 0x410   :  { %v284_v13 = vsel %vm173_vm2, %v1819_v12, 0.0 }
 0x411   :  { %285 = vadd.xlane.f32.xlu1 %v284_v13  ;;  %v391_v13 = vld [vmem:[%s2285_s5] sm:$0xf] }
 0x41f   :  { %293 = vrot.lane.b32.xlu0 %v2011_v39, %s1884_s2 }
 0x422   :  { %444 = vrot.lane.b32.xlu1 %v2013_v42, %s1885_s4 }
 0x423   :  { %392 = vrot.lane.b32.xlu0 %v2011_v39, %s1886_s20 }
 0x426   :  { %442 = vrot.lane.b32.xlu1 %v2013_v42, %s1886_s20 }
 0x496   :  { %v283_v14 = vpop.xlane.xlu0 %282 }
 0x497   :  { %1820 = vrcp.f32 %v283_v14 }
 0x49a   :  { %v294_v17 = vpop.permute.xlu0 %293 }
 0x49b   :  { %v300_v18 = vsel %vm298_vm4, %v294_v17, 0  ;;  %v666_v17 = vsel %vm298_vm4, %v391_v13, 0 }
 0x49c   :  { %1648 = vmatpush3.bf16.msra.mxu1 %v300_v18 }
 0x49d   :  { %1659 = vmatprep.subr.bf16.mxu1 %v1880_v15 }
 0x49e   :  { %v286_v19 = vpop.xlane.xlu1 %285  ;;  %v393_v28 = vpop.permute.xlu0 %392 }
 0x49f   :  { %1822 = vrcp.f32 %v286_v19 }
 0x4a1   :  { %v1821_v20 = vpop.eup %1820 }
 0x4a2   :  { %v289_v21 = vmul.f32 %v1821_v20, %v1817_v10  ;;  %v445_v26 = vpop.permute.xlu1 %444 }
 0x4a3   :  { %v450_v29 = vsel %vm173_vm2, %v445_v26, 0 }
 0x4a4   :  { %v291_v22 = vpack.c.bf16 %v289_v21, %v289_v21 }
 0x4a6   :  { %1650 = vmatmul.mubr.msk.bf16.vlgmr.msra.gmra.mrb[12].mxu1 %vm173_vm2, %v291_v22  ;;  %v443_v30 = vpop.permute.xlu1 %442  ;;  %v1541_v22 = vld [vmem:[%s2285_s5 + $0x4] sm:$0xf] }
 0x4a7   :  { %1660 = vmatpush3.bf16.xpose.msra.mxu1 %v400_v23  ;;  %1661 = vmatprep.mubr.msk.bf16.mxu1 %vm1881_vm1, %v1880_v15  ;;  %v619_v23 = vsel %vm298_vm4, %v1541_v22, 0 }
 0x4a8   :  { %1671 = vmatprep.subr.bf16.mxu1 %v1880_v15 }
 0x4a9   :  { %v1823_v24 = vpop.eup %1822 }
 0x4aa   :  { %v290_v25 = vmul.f32 %v1823_v24, %v1819_v12 }
 0x4ac   :  { %v292_v27 = vpack.c.bf16 %v290_v25, %v290_v25 }
 0x4ae   :  { %1656 = vmatmul.mubr.msk.bf16.vlgmr.msra.gmra.mrb[0].mxu0 %vm173_vm2, %v292_v27  ;;  %1662 = vmatmul.mubr.msk.bf16.vlgmr.msra.gmra.mrb[16].mxu1 %vm173_vm2, %v393_v28 }
 0x4af   :  { %1666 = vmatpush3.bf16.xpose.msra.mxu0 %v450_v29  ;;  %1667 = vmatprep.mubr.msk.bf16.mxu0 %vm1881_vm1, %v1880_v15 }
 0x4b0   :  { %1677 = vmatprep.subr.bf16.mxu0 %v1880_v15  ;;  %1673 = vmatprep.mubr.msk.bf16.mxu1 %vm1881_vm1, %v1880_v15 }
 0x4b6   :  { %1668 = vmatmul.mubr.msk.bf16.vlgmr.msra.gmra.mrb[4].mxu0 %vm173_vm2, %v443_v30 }
 0x4b7   :  { %1679 = vmatprep.mubr.msk.bf16.mxu0 %vm1881_vm1, %v1880_v15 }
 0x579   :  { %v2063_v31 = vpop.f32.mrb[12].mxu1 }
 0x57a   :  { %v1651_v32 = vpop.f32.mrb[13].mxu1 }
 0x57b   :  { %v339_v33 = vpop.f32.mrb[14].mxu1 }
 0x57c   :  { %v1652_v34 = vpop.f32.mrb[15].mxu1 }
 0x581   :  { %v2065_v35 = vpop.f32.mrb[0].mxu0  ;;  %v436_v36 = vpop.f32.mrb[16].mxu1 }
 0x582   :  { %v390_v37 = vpack.c.bf16 %v2065_v35, %v2063_v31  ;;  %v437_v38 = vadd.f32 %v436_v36, %v2029_v51  ;;  %v1657_v40 = vpop.f32.mrb[1].mxu0  ;;  %v1663_v41 = vpop.f32.mrb[17].mxu1 }
 0x583   :  { %v387_v43 = vpop.f32.mrb[2].mxu0  ;;  %v439_v44 = vpop.f32.mrb[18].mxu1 }
 0x584   :  { %v1658_v45 = vpop.f32.mrb[3].mxu0  ;;  %v1664_v46 = vpop.f32.mrb[19].mxu1  ;;  %v492_v47 = vsel %vm173_vm2, %v437_v38, -inf }
 0x585   :  { %493 = vmax.xlane.f32.xlu0 %v492_v47 }
 0x589   :  { %v486_v48 = vpop.f32.mrb[4].mxu0 }
 0x58a   :  { %v487_v49 = vadd.f32 %v486_v48, %v2029_v51  ;;  %v1669_v50 = vpop.f32.mrb[5].mxu0 }
 0x58b   :  { %v489_v52 = vpop.f32.mrb[6].mxu0 }
 0x58c   :  { %v1670_v53 = vpop.f32.mrb[7].mxu0  ;;  %v495_v54 = vsel %vm173_vm2, %v487_v49, -inf }
 0x58d   :  { %496 = vmax.xlane.f32.xlu1 %v495_v54 }
 0x59e   :  { %564 = vrot.lane.b32.xlu1 %v2013_v42, %s1887_s21 }
 0x5a2   :  { %711 = vrot.lane.b32.xlu1 %v2011_v39, %s1888_s22 }
 0x5a6   :  { %761 = vrot.lane.b32.xlu1 %v2013_v42, %s1888_s22 }
 0x5aa   :  { %759 = vrot.lane.b32.xlu1 %v2013_v42, %s1889_s23 }
 0x612   :  { %v494_v55 = vpop.xlane.xlu0 %493 }
 0x613   :  { %v498_v56 = vsub.f32 %v437_v38, %v494_v55 }
 0x615   :  { %v500_v57 = vmul.f32 1.442695, %v498_v56 }
 0x617   :  { %1824 = vpow2.f32 %v500_v57 }
 0x61a   :  { %v497_v58 = vpop.xlane.xlu1 %496 }
 0x61b   :  { %v499_v59 = vsub.f32 %v487_v49, %v497_v58 }
 0x61d   :  { %v502_v60 = vmul.f32 1.442695, %v499_v59 }
 0x61e   :  { %v565_v61 = vpop.permute.xlu1 %564 }
 0x61f   :  { %1826 = vpow2.f32 %v502_v60  ;;  %v570_v62 = vsel %vm298_vm4, %v565_v61, 0 }
 0x620   :  { %1678 = vmatpush3.bf16.msra.mxu0 %v570_v62 }
 0x621   :  { %v1825_v63 = vpop.eup %1824  ;;  %1689 = vmatprep.subr.bf16.mxu0 %v1880_v15 }
 0x622   :  { %v504_v2 = vsel %vm173_vm2, %v1825_v63, 0.0  ;;  %v712_v18 = vpop.permute.xlu1 %711 }
 0x623   :  { %505 = vadd.xlane.f32.xlu0 %v504_v2  ;;  %v717_v32 = vsel %vm173_vm2, %v712_v18, 0 }
 0x626   :  { %v762_v19 = vpop.permute.xlu1 %761 }
 0x627   :  { %v767_v20 = vsel %vm173_vm2, %v762_v19, 0 }
 0x629   :  { %v1827_v3 = vpop.eup %1826 }
 0x62a   :  { %v507_v4 = vsel %vm173_vm2, %v1827_v3, 0.0  ;;  %v760_v21 = vpop.permute.xlu1 %759 }
 0x62b   :  { %508 = vadd.xlane.f32.xlu0 %v507_v4 }
 0x641   :  { %516 = vrot.lane.b32.xlu0 %v2011_v39, %s1887_s21 }
 0x645   :  { %709 = vrot.lane.b32.xlu0 %v2011_v39, %s1889_s23 }
 0x6b0   :  { %v506_v5 = vpop.xlane.xlu0 %505 }
 0x6b1   :  { %1828 = vrcp.f32 %v506_v5 }
 0x6b8   :  { %v509_v6 = vpop.xlane.xlu0 %508 }
 0x6b9   :  { %1830 = vrcp.f32 %v509_v6 }
 0x6bb   :  { %v1829_v7 = vpop.eup %1828 }
 0x6bc   :  { %v512_v8 = vmul.f32 %v1829_v7, %v1825_v63  ;;  %v517_v9 = vpop.permute.xlu0 %516 }
 0x6bd   :  { %v522_v10 = vsel %vm298_vm4, %v517_v9, 0 }
 0x6be   :  { %1672 = vmatpush3.bf16.msra.mxu1 %v522_v10  ;;  %v514_v11 = vpack.c.bf16 %v512_v8, %v512_v8 }
 0x6bf   :  { %1683 = vmatprep.subr.bf16.mxu1 %v1880_v15 }
 0x6c0   :  { %v710_v36 = vpop.permute.xlu0 %709 }
 0x6c1   :  { %1674 = vmatmul.mubr.msk.bf16.vlgmr.msra.gmra.mrb[20].mxu1 %vm173_vm2, %v514_v11 }
 0x6c2   :  { %1685 = vmatprep.mubr.msk.bf16.mxu1 %vm1881_vm1, %v1880_v15  ;;  %1684 = vmatpush3.bf16.msra.mxu1 %v619_v23 }
 0x6c3   :  { %v1831_v12 = vpop.eup %1830  ;;  %1695 = vmatprep.subr.bf16.mxu1 %v1880_v15 }
 0x6c4   :  { %v513_v14 = vmul.f32 %v1831_v12, %v1827_v3 }
 0x6c6   :  { %v515_v16 = vpack.c.bf16 %v513_v14, %v513_v14 }
 0x6c8   :  { %1680 = vmatmul.mubr.msk.bf16.vlgmr.msra.gmra.mrb[8].mxu0 %vm173_vm2, %v515_v16 }
 0x6c9   :  { %1690 = vmatpush3.bf16.msra.mxu0 %v666_v17  ;;  %1691 = vmatprep.mubr.msk.bf16.mxu0 %vm1881_vm1, %v1880_v15 }
 0x6ca   :  { %1701 = vmatprep.subr.bf16.mxu0 %v1880_v15 }
 0x6d0   :  { %1692 = vmatmul.mubr.msk.bf16.vlgmr.msra.gmra.mrb[12].mxu0 %vm173_vm2, %v390_v37 }
 0x6d1   :  { %1703 = vmatprep.mubr.msk.bf16.mxu0 %vm1881_vm1, %v1880_v15 }
 0x6d2   :  { %1702 = vmatpush3.bf16.xpose.msra.mxu0 %v767_v20 }
 0x6d3   :  { %1713 = vmatprep.subr.bf16.mxu0 %v1880_v15 }
 0x6d9   :  { %1704 = vmatmul.mubr.msk.bf16.vlgmr.msra.gmra.mrb[16].mxu0 %vm173_vm2, %v760_v21 }
 0x6da   :  { %1715 = vmatprep.mubr.msk.bf16.mxu0 %vm1881_vm1, %v1880_v15 }
 0x794   :  { %v558_v24 = vpop.f32.mrb[20].mxu1 }
 0x795   :  { %v1675_v25 = vpop.f32.mrb[21].mxu1 }
 0x796   :  { %v561_v26 = vpop.f32.mrb[22].mxu1 }
 0x797   :  { %v1676_v27 = vpop.f32.mrb[23].mxu1 }
 0x79b   :  { %v606_v28 = vpop.f32.mrb[8].mxu0 }
 0x79c   :  { %v612_v29 = vpack.c.bf16 %v606_v28, %v558_v24  ;;  %v1681_v30 = vpop.f32.mrb[9].mxu0  ;;  %v1548_v28 = vld [vmem:[%s2285_s5 + $0x8] sm:$0xf] }
 0x79d   :  { %v609_v31 = vpop.f32.mrb[10].mxu0 }
 0x79e   :  { %v1682_v33 = vpop.f32.mrb[11].mxu0  ;;  %1686 = vmatmul.mubr.msk.bf16.vlgmr.msra.gmra.mrb[24].mxu1 %vm173_vm2, %v612_v29  ;;  %v936_v29 = vsel %vm298_vm4, %v1548_v28, 0 }
 0x79f   :  { %1696 = vmatpush3.bf16.xpose.msra.mxu1 %v717_v32  ;;  %1697 = vmatprep.mubr.msk.bf16.mxu1 %vm1881_vm1, %v1880_v15 }
 0x7a0   :  { %1707 = vmatprep.subr.bf16.mxu1 %v1880_v15 }
 0x7a3   :  { %v702_v34 = vpop.f32.mrb[12].mxu0 }
 0x7a4   :  { %v1693_v35 = vpop.f32.mrb[13].mxu0 }
 0x7a5   :  { %v705_v37 = vpop.f32.mrb[14].mxu0 }
 0x7a6   :  { %v1694_v38 = vpop.f32.mrb[15].mxu0  ;;  %1698 = vmatmul.mubr.msk.bf16.vlgmr.msra.gmra.mrb[28].mxu1 %vm173_vm2, %v710_v36 }
 0x7a7   :  { %1709 = vmatprep.mubr.msk.bf16.mxu1 %vm1881_vm1, %v1880_v15 }
 0x7ac   :  { %v803_v40 = vpop.f32.mrb[16].mxu0 }
 0x7ad   :  { %v804_v41 = vadd.f32 %v803_v40, %v2029_v51  ;;  %v1705_v43 = vpop.f32.mrb[17].mxu0 }
 0x7ae   :  { %v806_v44 = vpop.f32.mrb[18].mxu0 }
 0x7af   :  { %v1706_v45 = vpop.f32.mrb[19].mxu0  ;;  %v812_v46 = vsel %vm173_vm2, %v804_v41, -inf }
 0x7b0   :  { %813 = vmax.xlane.f32.xlu1 %v812_v46 }
 0x7c1   :  { %881 = vrot.lane.b32.xlu1 %v2013_v42, %s1890_s28 }
 0x7c5   :  { %983 = vrot.lane.b32.xlu1 %v2011_v39, %s1891_s0 }
 0x7c9   :  { %1033 = vrot.lane.b32.xlu1 %v2013_v42, %s1891_s0 }
 0x7cd   :  { %1031 = vrot.lane.b32.xlu1 %v2013_v42, %s1892_s29 }
 0x83d   :  { %v814_v47 = vpop.xlane.xlu1 %813 }
 0x83e   :  { %v816_v50 = vsub.f32 %v804_v41, %v814_v47 }
 0x840   :  { %v819_v52 = vmul.f32 1.442695, %v816_v50 }
 0x841   :  { %v882_v48 = vpop.permute.xlu1 %881 }
 0x842   :  { %v887_v49 = vsel %vm298_vm4, %v882_v48, 0  ;;  %1832 = vpow2.f32 %v819_v52 }
 0x843   :  { %1714 = vmatpush3.bf16.msra.mxu0 %v887_v49 }
 0x844   :  { %1725 = vmatprep.subr.bf16.mxu0 %v1880_v15 }
 0x845   :  { %v984_v13 = vpop.permute.xlu1 %983 }
 0x846   :  { %v989_v16 = vsel %vm173_vm2, %v984_v13, 0 }
 0x849   :  { %v1034_v36 = vpop.permute.xlu1 %1033 }
 0x84a   :  { %v1039_v43 = vsel %vm173_vm2, %v1034_v36, 0 }
 0x84c   :  { %v1833_v3 = vpop.eup %1832 }
 0x84d   :  { %v824_v4 = vsel %vm173_vm2, %v1833_v3, 0.0  ;;  %v1032_v45 = vpop.permute.xlu1 %1031 }
 0x871   :  { %v655_v53 = vpop.f32.mrb[24].mxu1 }
 0x872   :  { %v2130_v54 = vadd.f32 %v702_v34, %v655_v53  ;;  %v1687_v55 = vpop.f32.mrb[25].mxu1 }
 0x873   :  { %v658_v56 = vpop.f32.mrb[26].mxu1 }
 0x874   :  { %v2132_v57 = vadd.f32 %v705_v37, %v658_v56  ;;  %v1688_v58 = vpop.f32.mrb[27].mxu1 }
 0x879   :  { %v753_v59 = vpop.f32.mrb[28].mxu1 }
 0x87a   :  { %v754_v60 = vadd.f32 %v753_v59, %v2029_v51  ;;  %v1699_v61 = vpop.f32.mrb[29].mxu1 }
 0x87b   :  { %v756_v62 = vpop.f32.mrb[30].mxu1 }
 0x87c   :  { %v1700_v63 = vpop.f32.mrb[31].mxu1  ;;  %v809_v2 = vsel %vm173_vm2, %v754_v60, -inf }
 0x87d   :  { %810 = vmax.xlane.f32.xlu0 %v809_v2 }
 0x881   :  { %825 = vadd.xlane.f32.xlu0 %v824_v4 }
 0x90a   :  { %v811_v5 = vpop.xlane.xlu0 %810 }
 0x90b   :  { %v815_v6 = vsub.f32 %v754_v60, %v811_v5 }
 0x90d   :  { %v817_v7 = vmul.f32 1.442695, %v815_v6 }
 0x90e   :  { %v826_v8 = vpop.xlane.xlu0 %825 }
 0x90f   :  { %1834 = vpow2.f32 %v817_v7 }
 0x910   :  { %1836 = vrcp.f32 %v826_v8 }
 0x919   :  { %v1835_v9 = vpop.eup %1834 }
 0x91a   :  { %v1837_v10 = vpop.eup %1836  ;;  %v821_v11 = vsel %vm173_vm2, %v1835_v9, 0.0 }
 0x91b   :  { %v830_v12 = vmul.f32 %v1837_v10, %v1833_v3  ;;  %822 = vadd.xlane.f32.xlu0 %v821_v11 }
 0x91d   :  { %v832_v14 = vpack.c.bf16 %v830_v12, %v830_v12 }
 0x91f   :  { %1716 = vmatmul.mubr.msk.bf16.vlgmr.msra.gmra.mrb[20].mxu0 %vm173_vm2, %v832_v14 }
 0x920   :  { %1726 = vmatpush3.bf16.xpose.msra.mxu0 %v989_v16  ;;  %1727 = vmatprep.mubr.msk.bf16.mxu0 %vm1881_vm1, %v1880_v15 }
 0x921   :  { %1737 = vmatprep.subr.bf16.mxu0 %v1880_v15 }
 0x931   :  { %833 = vrot.lane.b32.xlu0 %v2011_v39, %s1890_s28 }
 0x935   :  { %981 = vrot.lane.b32.xlu0 %v2011_v39, %s1892_s29 }
 0x9a8   :  { %v823_v17 = vpop.xlane.xlu0 %822 }
 0x9a9   :  { %1838 = vrcp.f32 %v823_v17  ;;  %v1554_v17 = vld [vmem:[%s2285_s5 + $0xc] sm:$0xf] }
 0x9ac   :  { %v834_v18 = vpop.permute.xlu0 %833 }
 0x9ad   :  { %v839_v19 = vsel %vm298_vm4, %v834_v18, 0  ;;  %v1208_v18 = vsel %vm298_vm4, %v1554_v17, 0 }
 0x9ae   :  { %1708 = vmatpush3.bf16.msra.mxu1 %v839_v19 }
 0x9af   :  { %1719 = vmatprep.subr.bf16.mxu1 %v1880_v15 }
 0x9b0   :  { %v982_v20 = vpop.permute.xlu0 %981 }
 0x9b1   :  { %1728 = vmatmul.mubr.msk.bf16.vlgmr.msra.gmra.mrb[24].mxu0 %vm173_vm2, %v982_v20 }
 0x9b2   :  { %1739 = vmatprep.mubr.msk.bf16.mxu0 %vm1881_vm1, %v1880_v15 }
 0x9b3   :  { %v1839_v21 = vpop.eup %1838 }
 0x9b4   :  { %v829_v22 = vmul.f32 %v1839_v21, %v1835_v9 }
 0x9b6   :  { %v831_v23 = vpack.c.bf16 %v829_v22, %v829_v22 }
 0x9b8   :  { %1710 = vmatmul.mubr.msk.bf16.vlgmr.msra.gmra.mrb[32].mxu1 %vm173_vm2, %v831_v23 }
 0x9b9   :  { %1721 = vmatprep.mubr.msk.bf16.mxu1 %vm1881_vm1, %v1880_v15  ;;  %1720 = vmatpush3.bf16.msra.mxu1 %v936_v29  ;;  %v1556_v29 = vld [vmem:[%s2286_s6] ss:$0 sm:$0xff]  ;;  %s1516_s6 = sshll.u32 %s1894_s17, 4  ;;  %s1517_s6 = int_to_ptr.vmem [resolvable:$true] %s1516_s6 }
 0x9ba   :  { %1731 = vmatprep.subr.bf16.mxu1 %v1880_v15  ;;  %s1856_s18 = scalar_lea.vmem %s1517_s6, 256  ;;  %p1861_p1 = scmp.lt.s32.totalorder %s1517_s6, %s1517_s6 }
 0x9bb   :  { %p1857_p0 = scmp.ne.s32.totalorder %s1517_s6, %s1856_s18  ;;  %p1862_p2 = scmp.lt.s32.totalorder %s1856_s18, %s1856_s18 }
 0x9bd   :  { %p1863_p3 = por %p1862_p2, %p1861_p1 }
 0x9bf   :  { %p1864_p4 = pnand %p1863_p3, %p1857_p0 }
 0x9f2   :  { %v923_v24 = vpop.f32.mrb[20].mxu0 }
 0x9f3   :  { %v1717_v25 = vpop.f32.mrb[21].mxu0 }
 0x9f4   :  { %v926_v26 = vpop.f32.mrb[22].mxu0 }
 0x9f5   :  { %v1718_v27 = vpop.f32.mrb[23].mxu0 }
 0xa84   :  { %v1025_v30 = vpop.f32.mrb[24].mxu0 }
 0xa85   :  { %v1026_v31 = vadd.f32 %v1025_v30, %v2029_v51  ;;  %v1729_v32 = vpop.f32.mrb[25].mxu0 }
 0xa86   :  { %v1028_v33 = vpop.f32.mrb[26].mxu0 }
 0xa87   :  { %v1730_v34 = vpop.f32.mrb[27].mxu0  ;;  %v1081_v35 = vsel %vm173_vm2, %v1026_v31, -inf }
 0xa88   :  { %1082 = vmax.xlane.f32.xlu0 %v1081_v35 }
 0xa8b   :  { %v875_v37 = vpop.f32.mrb[32].mxu1 }
 0xa8c   :  { %v929_v38 = vpack.c.bf16 %v923_v24, %v875_v37  ;;  %v1711_v40 = vpop.f32.mrb[33].mxu1 }
 0xa8d   :  { %v878_v41 = vpop.f32.mrb[34].mxu1 }
 0xa8e   :  { %v1712_v44 = vpop.f32.mrb[35].mxu1  ;;  %1722 = vmatmul.mubr.msk.bf16.vlgmr.msra.gmra.mrb[36].mxu1 %vm173_vm2, %v929_v38 }
 0xa8f   :  { %1732 = vmatpush3.bf16.xpose.msra.mxu1 %v1039_v43  ;;  %1733 = vmatprep.mubr.msk.bf16.mxu1 %vm1881_vm1, %v1880_v15 }
 0xa90   :  { %1743 = vmatprep.subr.bf16.mxu1 %v1880_v15 }
 0xa96   :  { %1734 = vmatmul.mubr.msk.bf16.vlgmr.msra.gmra.mrb[40].mxu1 %vm173_vm2, %v1032_v45 }
 0xa97   :  { %1745 = vmatprep.mubr.msk.bf16.mxu1 %vm1881_vm1, %v1880_v15 }
 0xb15   :  { %v1083_v46 = vpop.xlane.xlu0 %1082 }
 0xb16   :  { %v1087_v47 = vsub.f32 %v1026_v31, %v1083_v46 }
 0xb18   :  { %v1089_v48 = vmul.f32 1.442695, %v1087_v47 }
 0xb1a   :  { %1840 = vpow2.f32 %v1089_v48 }
 0xb24   :  { %v1841_v49 = vpop.eup %1840 }
 0xb25   :  { %v1093_v50 = vsel %vm173_vm2, %v1841_v49, 0.0 }
 0xb26   :  { %1094 = vadd.xlane.f32.xlu0 %v1093_v50 }
 0xb61   :  { %v972_v52 = vpop.f32.mrb[36].mxu1 }
 0xb62   :  { %v979_v53 = vadd.f32 %v972_v52, %v2130_v54  ;;  %v1723_v55 = vpop.f32.mrb[37].mxu1  ;;  %v1802_v52 = vld [vmem:[%s2289_s9] sm:$0xff]  }
 0xb63   :  { %v975_v56 = vpop.f32.mrb[38].mxu1 }
 0xb64   :  { %v980_v58 = vadd.f32 %v975_v56, %v2132_v57  ;;  %v1724_v59 = vpop.f32.mrb[39].mxu1 }
 0xb69   :  { %v1075_v60 = vpop.f32.mrb[40].mxu1 }
 0xb6a   :  { %v1076_v61 = vadd.f32 %v1075_v60, %v2029_v51  ;;  %v1735_v62 = vpop.f32.mrb[41].mxu1 }
 0xb6b   :  { %v1078_v63 = vpop.f32.mrb[42].mxu1 }
 0xb6c   :  { %v1736_v2 = vpop.f32.mrb[43].mxu1  ;;  %v1084_v3 = vsel %vm173_vm2, %v1076_v61, -inf  ;;  %v1557_v63 = vld [vmem:[%s2287_s7] ss:$0 sm:$0xff] }
 0xb6d   :  { %1085 = vmax.xlane.f32.xlu1 %v1084_v3 }
 0xb7e   :  { %1153 = vrot.lane.b32.xlu1 %v2013_v42, %s1893_s3 }
 0xbb3   :  { %v1095_v8 = vpop.xlane.xlu0 %1094 }
 0xbfa   :  { %v1086_v4 = vpop.xlane.xlu1 %1085 }
 0xbfb   :  { %v1088_v5 = vsub.f32 %v1076_v61, %v1086_v4 }
 0xbfd   :  { %v1091_v54 = vmul.f32 1.442695, %v1088_v5 }
 0xbfe   :  { %v1154_v6 = vpop.permute.xlu1 %1153 }
 0xbff   :  { %1842 = vpow2.f32 %v1091_v54  ;;  %v1159_v57 = vsel %vm298_vm4, %v1154_v6, 0  ;;  %v1558_v54 = vld [vmem:[%s2288_s8] ss:$0 sm:$0xff] }
 0xc00   :  { %1744 = vmatpush3.bf16.msra.mxu1 %v1159_v57  ;;  %1844 = vrcp.f32 %v1095_v8  ;;  %v1804_v8 = vld [vmem:[%s2291_s11] sm:$0xff]  }
 0xc01   :  { %1755 = vmatprep.subr.bf16.mxu1 %v1880_v15 }
 0xc09   :  { %v1843_v51 = vpop.eup %1842 }
 0xc0a   :  { %v1096_v7 = vsel %vm173_vm2, %v1843_v51, 0.0  ;;  %v1845_v9 = vpop.eup %1844 }
 0xc0b   :  { %1097 = vadd.xlane.f32.xlu0 %v1096_v7  ;;  %v1101_v10 = vmul.f32 %v1845_v9, %v1841_v49  ;;  %v1805_v9 = vld [vmem:[%s2291_s11 + $0x8] sm:$0xff]  }
 0xc0d   :  { %v1103_v13 = vpack.c.bf16 %v1101_v10, %v1101_v10  ;;  %v1807_v10 = vld [vmem:[%s2291_s11 + $0x18] sm:$0xff]  }
 0xc21   :  { %1105 = vrot.lane.b32.xlu0 %v2011_v39, %s1893_s3 }
 0xc98   :  { %v1098_v42 = vpop.xlane.xlu0 %1097 }
 0xc99   :  { %1846 = vrcp.f32 %v1098_v42  ;;  %v1806_v42 = vld [vmem:[%s2291_s11 + $0x10] sm:$0xff]  }
 0xc9c   :  { %v1106_v11 = vpop.permute.xlu0 %1105 }
 0xc9d   :  { %v1111_v12 = vsel %vm298_vm4, %v1106_v11, 0  ;;  %v1808_v11 = vld [vmem:[%s2291_s11 + $0x20] sm:$0xff]  }
 0xc9e   :  { %1738 = vmatpush3.bf16.msra.mxu0 %v1111_v12  ;;  %v1809_v12 = vld [vmem:[%s2291_s11 + $0x28] sm:$0xff]  }
 0xc9f   :  { %1749 = vmatprep.subr.bf16.mxu0 %v1880_v15 }
 0xca1   :  { %1740 = vmatmul.mubr.msk.bf16.vlgmr.msra.gmra.mrb[28].mxu0 %vm173_vm2, %v1103_v13  ;;  %v1810_v13 = vld [vmem:[%s2291_s11 + $0x30] sm:$0xff]  }
 0xca2   :  { %1751 = vmatprep.mubr.msk.bf16.mxu0 %vm1881_vm1, %v1880_v15  ;;  %1750 = vmatpush3.bf16.msra.mxu0 %v1208_v18 }
 0xca3   :  { %v1847_v14 = vpop.eup %1846  ;;  %1763 = vmatprep.subr.bf16.mxu0 %v1880_v15 }
 0xca4   :  { %v1102_v39 = vmul.f32 %v1847_v14, %v1843_v51  ;;  %v1811_v14 = vld [vmem:[%s2291_s11 + $0x38] sm:$0xff]  }
 0xca6   :  { %v1104_v16 = vpack.c.bf16 %v1102_v39, %v1102_v39  ;;  %v1559_v39 = vld [vmem:[%s2290_s10] ss:$0 sm:$0xff] }
 0xca8   :  { %1746 = vmatmul.mubr.msk.bf16.vlgmr.msra.gmra.mrb[44].mxu1 %vm173_vm2, %v1104_v16 }
 0xca9   :  { %1759 = vmatprep.mubr.msk.bf16.mxu1 %vm1881_vm1, %v1880_v15  ;;  %1756 = vmatpush3.bf16.msra.mxu1 %v1802_v52 }
 0xcaa   :  { %1757 = vmatprep.subr.bf16.mxu1 %v1880_v15 }
 0xd74   :  { %v1147_v19 = vpop.f32.mrb[28].mxu0 }
 0xd75   :  { %v1741_v20 = vpop.f32.mrb[29].mxu0 }
 0xd76   :  { %v1150_v21 = vpop.f32.mrb[30].mxu0 }
 0xd77   :  { %v1742_v22 = vpop.f32.mrb[31].mxu0 }
 0xd7b   :  { %v1195_v23 = vpop.f32.mrb[44].mxu1 }
 0xd7c   :  { %v1201_v24 = vpack.c.bf16 %v1195_v23, %v1147_v19  ;;  %v1747_v25 = vpop.f32.mrb[45].mxu1 }
 0xd7d   :  { %v1198_v26 = vpop.f32.mrb[46].mxu1 }
 0xd7e   :  { %v1748_v27 = vpop.f32.mrb[47].mxu1  ;;  %1752 = vmatmul.mubr.msk.bf16.vlgmr.msra.gmra.mrb[32].mxu0 %vm173_vm2, %v1201_v24 }
 0xd7f   :  { %1779 = vmatprep.mubr.msk.bf16.mxu0 %vm1881_vm1, %v1880_v15  ;;  %1764 = vmatpush3.bf16.msra.mxu0 %v1804_v8 }
 0xd80   :  { %1765 = vmatprep.subr.bf16.mxu0 %v1880_v15 }
 0xd83   :  { %1766 = vmatpush3.bf16.msra.mxu0 %v1805_v9 }
 0xd84   :  { %1767 = vmatprep.subr.bf16.mxu0 %v1880_v15 }
 0xd87   :  { %1768 = vmatpush3.bf16.msra.mxu0 %v1806_v42 }
 0xd88   :  { %1769 = vmatprep.subr.bf16.mxu0 %v1880_v15 }
 0xd8b   :  { %1770 = vmatpush3.bf16.msra.mxu0 %v1807_v10 }
 0xd8c   :  { %1771 = vmatprep.subr.bf16.mxu0 %v1880_v15 }
 0xd8f   :  { %1772 = vmatpush3.bf16.msra.mxu0 %v1808_v11 }
 0xd90   :  { %1773 = vmatprep.subr.bf16.mxu0 %v1880_v15 }
 0xd93   :  { %1774 = vmatpush3.bf16.msra.mxu0 %v1809_v12 }
 0xd94   :  { %1775 = vmatprep.subr.bf16.mxu0 %v1880_v15 }
 0xd97   :  { %1776 = vmatpush3.bf16.msra.mxu0 %v1810_v13 }
 0xd98   :  { %1777 = vmatprep.subr.bf16.mxu0 %v1880_v15 }
 0xd9b   :  { %1778 = vmatpush3.bf16.msra.mxu0 %v1811_v14 }
 0xe51   :  { %v1244_v28 = vpop.f32.mrb[32].mxu0 }
 0xe52   :  { %v1251_v30 = vadd.f32 %v1244_v28, %v979_v53  ;;  %v1753_v31 = vpop.f32.mrb[33].mxu0  ;;  %v1803_v53 = vld [vmem:[%s2289_s9 + $0x8] sm:$0xff]  }
 0xe53   :  { %v1247_v32 = vpop.f32.mrb[34].mxu0  ;;  %1758 = vmatpush3.bf16.msra.mxu1 %v1803_v53 }
 0xe54   :  { %v1260_v33 = vadd.f32 %v1556_v29, %v1251_v30  ;;  %v1252_v34 = vadd.f32 %v1247_v32, %v980_v58  ;;  %v1754_v35 = vpop.f32.mrb[35].mxu0 }
 0xe56   :  { %v2200_v36 = vadd.f32 %v1260_v33, %v1970_v0  ;;  %v1261_v37 = vadd.f32 %v1556_v29, %v1252_v34 }
 0xe58   :  { %v2203_v38 = vadd.f32 %v1261_v37, %v1975_v1  ;;  %v1266_v40 = vsel %vm50_vm0, %v2200_v36, 0.0 }
 0xe59   :  { %1267 = vadd.xlane.f32.xlu1 %v1266_v40 }
 0xe5a   :  { %v1269_v41 = vsel %vm50_vm0, %v2203_v38, 0.0 }
 0xe5b   :  { %1270 = vadd.xlane.f32.xlu0 %v1269_v41 }
 0xee6   :  { %v1268_v43 = vpop.xlane.xlu1 %1267 }
 0xee7   :  { %v1272_v44 = vmul.f32 0.03125, %v1268_v43 }
 0xee8   :  { %v1271_v45 = vpop.xlane.xlu0 %1270 }
 0xee9   :  { %v1274_v46 = vsub.f32 %v2200_v36, %v1272_v44  ;;  %v1273_v47 = vmul.f32 0.03125, %v1271_v45  ;;  %v1563_v44 = vld [vmem:[%s2292_s12] ss:$0 sm:$0xff] }
 0xeeb   :  { %v1275_v0 = vsub.f32 %v2203_v38, %v1273_v47  ;;  %v1276_v48 = vmul.f32 %v1274_v46, %v1274_v46 }
 0xeed   :  { %v1278_v1 = vsel %vm50_vm0, %v1276_v48, 0.0  ;;  %v1277_v49 = vmul.f32 %v1275_v0, %v1275_v0 }
 0xeee   :  { %1279 = vadd.xlane.f32.xlu0 %v1278_v1 }
 0xeef   :  { %v1281_v50 = vsel %vm50_vm0, %v1277_v49, 0.0 }
 0xef0   :  { %1282 = vadd.xlane.f32.xlu1 %v1281_v50 }
 0xf7b   :  { %v1280_v55 = vpop.xlane.xlu0 %1279 }
 0xf7c   :  { %v1284_v56 = vmul.f32 0.03125, %v1280_v55 }
 0xf7d   :  { %v1283_v58 = vpop.xlane.xlu1 %1282 }
 0xf7e   :  { %v1286_v59 = vadd.f32 1e-05, %v1284_v56  ;;  %v1285_v60 = vmul.f32 0.03125, %v1283_v58 }
 0xf80   :  { %1848 = vrsqrt.f32 %v1286_v59  ;;  %v1287_v61 = vadd.f32 1e-05, %v1285_v60 }
 0xf82   :  { %1850 = vrsqrt.f32 %v1287_v61 }
 0xf8a   :  { %v1849_v62 = vpop.eup %1848 }
 0xf8b   :  { %v1290_v2 = vmul.f32 %v1849_v62, %v1274_v46 }
 0xf8c   :  { %v1851_v3 = vpop.eup %1850 }
 0xf8d   :  { %v1298_v4 = vmul.f32 %v1557_v63, %v1290_v2  ;;  %v1291_v5 = vmul.f32 %v1851_v3, %v1275_v0 }
 0xf8f   :  { %v1299_v6 = vmul.f32 %v1557_v63, %v1291_v5  ;;  %v1306_v57 = vadd.f32 %v1558_v54, %v1298_v4 }
 0xf91   :  { %v1307_v51 = vadd.f32 %v1558_v54, %v1299_v6 }
 0xf93   :  { %v1308_v7 = vpack.c.bf16 %v1307_v51, %v1306_v57 }
 0xf95   :  { %1760 = vmatmul.mubr.msk.bf16.vlgmr.msra.gmra.mrb[48].mxu1 %vm50_vm0, %v1308_v7 }
0x1068   :  { %v1369_v16 = vpop.f32.mrb[48].mxu1 }
0x1069   :  { %v1370_v17 = vadd.f32 %v1559_v39, %v1369_v16  ;;  %v1761_v18 = vpop.f32.mrb[49].mxu1 }
0x106a   :  { %v1372_v19 = vpop.f32.mrb[50].mxu1 }
0x106b   :  { %v1378_v20 = vmul.f32 0.044715, %v1370_v17  ;;  %v1373_v21 = vadd.f32 %v1559_v39, %v1372_v19  ;;  %v1762_v22 = vpop.f32.mrb[51].mxu1  ;;  %v1376_v34 = vmul.f32 0.5, %v1370_v17 }
0x106d   :  { %v1380_v23 = vmul.f32 %v1378_v20, %v1370_v17  ;;  %v1379_v24 = vmul.f32 0.044715, %v1373_v21  ;;  %v1377_v35 = vmul.f32 0.5, %v1373_v21 }
0x106f   :  { %v1382_v25 = vmul.f32 %v1380_v23, %v1370_v17  ;;  %v1381_v26 = vmul.f32 %v1379_v24, %v1373_v21 }
0x1071   :  { %v1384_v27 = vadd.f32 %v1382_v25, %v1370_v17  ;;  %v1383_v28 = vmul.f32 %v1381_v26, %v1373_v21 }
0x1073   :  { %v1386_v29 = vmul.f32 0.7978846, %v1384_v27  ;;  %v1385_v15 = vadd.f32 %v1383_v28, %v1373_v21 }
0x1075   :  { %1852 = vtanh.f32 %v1386_v29  ;;  %v1387_v30 = vmul.f32 0.7978846, %v1385_v15 }
0x1077   :  { %1854 = vtanh.f32 %v1387_v30 }
0x107f   :  { %v1853_v31 = vpop.eup %1852 }
0x1080   :  { %v1390_v32 = vadd.f32 1.0, %v1853_v31 }
0x1081   :  { %v1855_v33 = vpop.eup %1854 }
0x1082   :  { %v1391_v37 = vadd.f32 1.0, %v1855_v33  ;;  %v1392_v40 = vmul.f32 %v1390_v32, %v1376_v34 }
0x1084   :  { %v1393_v41 = vmul.f32 %v1391_v37, %v1377_v35 }
0x1086   :  { %v1394_v43 = vpack.c.bf16 %v1393_v41, %v1392_v40 }
0x1088   :  { %1780 = vmatmul.mubr.bf16.vlgmr.msra.gmra.mrb[36].mxu0 %v1394_v43 }
0x115b   :  { %v1500_v45 = vpop.f32.mrb[36].mxu0 }
0x115c   :  { %v1501_v46 = vadd.f32 %v1563_v44, %v1500_v45  ;;  %v1781_v47 = vpop.f32.mrb[37].mxu0 }
0x115d   :  { %v1503_v0 = vpop.f32.mrb[38].mxu0 }
0x115e   :  { %v1507_v48 = vadd.f32 %v1501_v46, %v2200_v36  ;;  %v1504_v1 = vadd.f32 %v1563_v44, %v1503_v0  ;;  %v1782_v49 = vpop.f32.mrb[39].mxu0 }
0x1160   :  { %1509 = vst.msk [vmem:[#allocation2] sm:$0xff] %vm50_vm0, %v1507_v48  ;;  %v1508_v50 = vadd.f32 %v1504_v1, %v2203_v38 }
0x1162   :  { %1510 = vst.msk [vmem:[#allocation2 + $0x8] sm:$0xff] %vm50_vm0, %v1508_v50 }
0x1163   :  { %1867 = shalt.err (!%p1864_p4)
}
0x1164   :  { %s1868_s1 = scalar_lea.hbm %s2293_s13, 256 }
0x1165   :  { %p1869_p5 = scmp.ne.s32.totalorder %s2293_s13, %s1868_s1  ;;  %p1872_p6 = scmp.lt.u32.totalorder %s1868_s1, %s2293_s13 }
0x1167   :  { %p1874_p7 = pnand %p1872_p6, %p1869_p5 }
0x1169   :  { %1877 = shalt.err (!%p1874_p7)
}
0x116a   :  { %s1895_s21 = smov 128   ;;  %s1896_s22 = smov 8  }
0x116b   :  { %1522 = dma.vmem_to_hbm [thread:$0]  %s1517_s6, 256, %s2293_s13, [#allocation3], %s1895_s21, %s1895_s21, %s1896_s22  }
0x116c   :  { %1878 = dma.done.wait [#allocation3], 256  }
0x116d   :  { %1879 = vsyncadd [#allocation3], 4294967040 }
0x116e   :  { %1526 = vsyncpa [#allocation3], 1 }

</bundles_post_ra>
